<compile_context>
chip_gen: v5e
topology: v5e:2x2
jax: 0.10.0
libtpu: 0.0.40
codegen_flags: <defaults>
</compile_context>

<pallas_src>
import numpy as np
import jax
import jax.numpy as jnp
from jax.experimental import pallas as pl
from jax.experimental.pallas import tpu as pltpu

# ---- model hyper-params (small, consistent with the module's __init__) ----
T = 8             # sequence length
B = 8             # batch size
STATE_DIM = 16
LINEAR_DIM = 32
HIDDEN_DIM = 32   # must equal LINEAR_DIM for the packed weight layout below
NUM_LAYERS = 2    # kernel implements the 2-layer interleave explicitly
NEG_SLOPE = 0.01  # F.leaky_relu default

assert LINEAR_DIM == HIDDEN_DIM
assert NUM_LAYERS == 2
assert T * B <= 128


def rnn_critic_kernel(state_ref, h0_ref, pf32_ref, wq_ref, v_ref, newh_ref, y_scr):
    T_, B_, S_ = state_ref.shape
    L_, _, H_ = h0_ref.shape
    TB = T_ * B_
    H2, H3 = 2 * H_, 3 * H_
    W9 = 9 * H_

    # ---- unpack packed parameter slabs (static sub-tile slices, one-time) ----
    wfc      = pf32_ref[0:S_, 0:H_]                     # (16, 32)  fc weight (in, out)
    bfc      = pf32_ref[S_:S_ + 1, 0:H_]                # (1, 32)
    wv_row   = pf32_ref[S_ + 1:S_ + 2, 0:H_]            # (1, 32)   value head weight (pre-T)
    bias_rnd = pf32_ref[S_ + 2:S_ + 3, :]               # (1, 288)  per-round block bias
    b_gi0    = pf32_ref[S_ + 3:S_ + 4, 0:H3]            # (1, 96)   b_ih0 + [b_hh0_rz, 0]
    bv64     = pf32_ref[S_ + 3:S_ + 4, H3:H3 + TB]      # (1, 64)   value bias, pre-broadcast
    w_ih0    = wq_ref[0:H_, 0:H3]                       # (32, 96)  bf16
    w_blk    = wq_ref[H_:3 * H_, :]                     # (64, 288) bf16 block weight

    # ---- fc -> leaky_relu: one (T*B, S) @ (S, H) matmul ----
    st = state_ref[...].reshape(TB, S_)
    x = jnp.dot(st, wfc, preferred_element_type=jnp.float32) + bfc
    x = jnp.maximum(x, NEG_SLOPE * x)                   # leaky_relu (slope < 1)

    # ---- hoisted layer-0 input projection (bf16 operands, f32 accum) ----
    gi0_seq = jnp.dot(x.astype(jnp.bfloat16), w_ih0,
                      preferred_element_type=jnp.float32) + b_gi0    # (64, 96)

    # Hoist the (1, 9H) -> (B, 9H) broadcast out of the round loop.
    bias_b = jnp.broadcast_to(bias_rnd, (B_, W9))

    # ---- interleaved 2-layer GRU: T+1 = 9 rounds instead of 2*T = 16 ----
    # Round r: layer 0 advances to step r, layer 1 advances to step r-1.
    # Block result columns: [gh0_r gh0_z gh0_n+bhh0n | gi1 (+b_gi1) | gh1_r gh1_z gh1_n+bhh1n]
    h0 = h0_ref[0]                                      # (8, 32) layer-0 state
    h1 = h0_ref[1]                                      # (8, 32) layer-1 state
    for r in range(T_ + 1):                             # fully unrolled, static
        h_cat = jnp.concatenate([h0, h1], axis=1).astype(jnp.bfloat16)   # (8, 64)
        g = jnp.dot(h_cat, w_blk, preferred_element_type=jnp.float32) + bias_b  # (8, 288)

        if r < T_:                                      # layer 0, step r
            gi0 = gi0_seq[r * B_:(r + 1) * B_]          # (8, 96) sublane-aligned slice
            rz0 = jax.nn.sigmoid(gi0[:, :H2] + g[:, :H2])
            n0 = jnp.tanh(gi0[:, H2:H3] + rz0[:, :H_] * g[:, H2:H3])
            z0 = rz0[:, H_:H2]
            h0 = (1.0 - z0) * n0 + z0 * h0

        if r >= 1:                                      # layer 1, step r-1
            rz1 = jax.nn.sigmoid(g[:, H3:H3 + H2] + g[:, 2 * H3:2 * H3 + H2])
            n1 = jnp.tanh(g[:, H3 + H2:2 * H3] + rz1[:, :H_] * g[:, 2 * H3 + H2:])
            z1 = rz1[:, H_:H2]
            h1 = (1.0 - z1) * n1 + z1 * h1
            y_scr[(r - 1) * B_:r * B_, :] = h1          # stage output, off the chain

    # ---- epilogue: tanh, value head (VPU mul -> XLU transpose -> sublane reduce) ----
    y = jnp.tanh(y_scr[...])                            # (64, 32)
    v = jnp.sum((y * wv_row).T, axis=0, keepdims=True) + bv64          # (1, 64) lane-dense
    pad = v_ref.shape[1] - TB
    v_ref[...] = jnp.concatenate([v, jnp.zeros((1, pad), jnp.float32)], axis=1)

    # new_hidden = tanh(input hidden), exactly as the reference module does
    newh_ref[...] = jnp.tanh(h0_ref[...])


def pack_params(params):
    """Constant-fold biases and pack all parameters into 2 contiguous slabs."""
    wfc, bfc, wih, whh, bih, bhh, wv, bv = params
    H = HIDDEN_DIM
    H2, H3, W9 = 2 * H, 3 * H, 9 * H
    f32 = jnp.float32

    # Fold b_ih and the r/z part of b_hh into the input-projection bias; only
    # b_hh_n must stay inside r * (h @ W_hh_n + b_hh_n) -> folded into the
    # n-columns of the gh part of the per-round block bias.
    def gi_bias(l):
        return bih[l] + jnp.concatenate([bhh[l][:, :H2], jnp.zeros((1, H), f32)], axis=1)

    b_gi0, b_gi1 = gi_bias(0), gi_bias(1)
    bias_rnd = jnp.concatenate(
        [jnp.zeros((1, H2), f32), bhh[0][:, H2:],       # gh0: + b_hh0_n in n cols
         b_gi1,                                          # gi1: full folded bias
         jnp.zeros((1, H2), f32), bhh[1][:, H2:]],       # gh1: + b_hh1_n in n cols
        axis=1)                                          # (1, 288)

    def pad_lanes(a):
        return jnp.pad(a, ((0, 0), (0, W9 - a.shape[1])))

    row_bgi0_bv = jnp.concatenate(
        [b_gi0,                                          # cols [0, 96)
         jnp.broadcast_to(bv, (1, T * B)),               # cols [96, 160): bv pre-broadcast
         jnp.zeros((1, W9 - H3 - T * B), f32)], axis=1)

    pf32 = jnp.concatenate([
        pad_lanes(wfc),          # rows 0..15 : fc weight
        pad_lanes(bfc),          # row 16     : fc bias
        pad_lanes(wv.T),         # row 17     : value weight as (1, H)
        bias_rnd,                # row 18     : per-round block bias
        row_bgi0_bv,             # row 19     : layer-0 gi bias | value bias
    ], axis=0).astype(f32)                               # (20, 288) f32

    zeros_blk = jnp.zeros((H, H3), f32)
    w_blk = jnp.concatenate([
        jnp.concatenate([whh[0], wih[1], zeros_blk], axis=1),        # (32, 288)
        jnp.concatenate([zeros_blk, zeros_blk, whh[1]], axis=1),     # (32, 288)
    ], axis=0)                                                       # (64, 288)
    w_ih0_pad = jnp.pad(wih[0], ((0, 0), (0, W9 - H3)))              # (32, 288)
    w_bf16 = jnp.concatenate([w_ih0_pad, w_blk], axis=0).astype(jnp.bfloat16)  # (96, 288)
    return pf32, w_bf16


def rnn_critic_forward(state, h0, packed):
    pf32, w_bf16 = packed
    T_, B_, _ = state.shape
    L_, _, H_ = h0.shape
    vmem = pl.BlockSpec(memory_space=pltpu.MemorySpace.VMEM)
    v_pad, new_h = pl.pallas_call(
        rnn_critic_kernel,
        out_shape=(jax.ShapeDtypeStruct((1, 128), jnp.float32),
                   jax.ShapeDtypeStruct((L_, B_, H_), jnp.float32)),
        in_specs=[vmem] * 4,
        out_specs=(vmem, vmem),
        scratch_shapes=[pltpu.VMEM((T_ * B_, H_), jnp.float32)],
    )(state, h0, pf32, w_bf16)
    return v_pad[:, :T_ * B_].reshape(T_, B_, 1), new_h


def reference_forward(state, h0, params):
    """Pure-JAX reference (mirrors torch semantics)."""
    wfc, bfc, wih, whh, bih, bhh, wv, bv = params
    H = h0.shape[-1]
    x = state @ wfc + bfc[0]
    x = jnp.where(x >= 0, x, NEG_SLOPE * x)
    seq = x
    for l in range(h0.shape[0]):
        h = h0[l]
        outs = []
        for t in range(seq.shape[0]):
            gi = seq[t] @ wih[l] + bih[l, 0]
            gh = h @ whh[l] + bhh[l, 0]
            r = jax.nn.sigmoid(gi[:, :H] + gh[:, :H])
            z = jax.nn.sigmoid(gi[:, H:2 * H] + gh[:, H:2 * H])
            n = jnp.tanh(gi[:, 2 * H:] + r * gh[:, 2 * H:])
            h = (1.0 - z) * n + z * h
            outs.append(h)
        seq = jnp.stack(outs, 0)
    y = jnp.tanh(seq)
    return y @ wv + bv[0], jnp.tanh(h0)


def init_params(key):
    ks = jax.random.split(key, 8)

    def unif(k, shape, bound):
        return jax.random.uniform(k, shape, jnp.float32, -bound, bound)

    b_fc = 1.0 / np.sqrt(STATE_DIM)
    b_gr = 1.0 / np.sqrt(HIDDEN_DIM)
    b_v = 1.0 / np.sqrt(HIDDEN_DIM)
    wfc = unif(ks[0], (STATE_DIM, LINEAR_DIM), b_fc)          # fc.weight.T
    bfc = unif(ks[1], (1, LINEAR_DIM), b_fc)
    # per-layer GRU weights, gate order [r, z, n]; layer0 in_dim=LINEAR_DIM==HIDDEN_DIM
    wih = unif(ks[2], (NUM_LAYERS, LINEAR_DIM, 3 * HIDDEN_DIM), b_gr)
    whh = unif(ks[3], (NUM_LAYERS, HIDDEN_DIM, 3 * HIDDEN_DIM), b_gr)
    bih = unif(ks[4], (NUM_LAYERS, 1, 3 * HIDDEN_DIM), b_gr)
    bhh = unif(ks[5], (NUM_LAYERS, 1, 3 * HIDDEN_DIM), b_gr)
    wv = unif(ks[6], (HIDDEN_DIM, 1), b_v)                    # v.weight.T
    bv = unif(ks[7], (1, 1), b_v)
    return (wfc, bfc, wih, whh, bih, bhh, wv, bv)


if __name__ == "__main__":
    key = jax.random.PRNGKey(0)
    k_state, k_hidden, k_params = jax.random.split(key, 3)
    state = jax.random.normal(k_state, (T, B, STATE_DIM), jnp.float32)
    hidden = jax.random.normal(k_hidden, (NUM_LAYERS, B, HIDDEN_DIM), jnp.float32)
    params = init_params(k_params)

    packed = pack_params(params)   # one-time, wrapper-side constant folding
    v_out, new_hidden = rnn_critic_forward(state, hidden, packed)
    jax.block_until_ready((v_out, new_hidden))

    v_ref, h_ref = reference_forward(state, hidden, params)
    np.testing.assert_allclose(np.asarray(v_out), np.asarray(v_ref),
                               rtol=5e-3, atol=5e-3)
    np.testing.assert_allclose(np.asarray(new_hidden), np.asarray(h_ref),
                               rtol=5e-3, atol=5e-3)
    print("KERNEL_OK")
</pallas_src>

<mosaic_0001>
module attributes {stable_mosaic.version = 11 : i64} {
  func.func @rnn_critic_kernel(%arg0: memref<8x8x16xf32, #tpu.memory_space<vmem>>, %arg1: memref<2x8x32xf32, #tpu.memory_space<vmem>>, %arg2: memref<20x288xf32, #tpu.memory_space<vmem>>, %arg3: memref<96x288xbf16, #tpu.memory_space<vmem>>, %arg4: memref<1x128xf32, #tpu.memory_space<vmem>>, %arg5: memref<2x8x32xf32, #tpu.memory_space<vmem>>, %arg6: memref<64x32xf32, #tpu.memory_space<vmem>>) attributes {dimension_semantics = [], scalar_prefetch = 0 : i64, scratch_operands = 1 : i64, tpu.core_type = #tpu.core_type<tc>} {
    %c0 = arith.constant 0 : index
    %c0_0 = arith.constant 0 : index
    %0 = vector.load %arg2[%c0, %c0_0] : memref<20x288xf32, #tpu.memory_space<vmem>>, vector<16x32xf32>
    %c16 = arith.constant 16 : index
    %c0_1 = arith.constant 0 : index
    %1 = vector.load %arg2[%c16, %c0_1] : memref<20x288xf32, #tpu.memory_space<vmem>>, vector<1x32xf32>
    %c17 = arith.constant 17 : index
    %c0_2 = arith.constant 0 : index
    %2 = vector.load %arg2[%c17, %c0_2] : memref<20x288xf32, #tpu.memory_space<vmem>>, vector<1x32xf32>
    %c18 = arith.constant 18 : index
    %c0_3 = arith.constant 0 : index
    %3 = vector.load %arg2[%c18, %c0_3] : memref<20x288xf32, #tpu.memory_space<vmem>>, vector<1x288xf32>
    %c19 = arith.constant 19 : index
    %c0_4 = arith.constant 0 : index
    %4 = vector.load %arg2[%c19, %c0_4] : memref<20x288xf32, #tpu.memory_space<vmem>>, vector<1x96xf32>
    %c19_5 = arith.constant 19 : index
    %c96 = arith.constant 96 : index
    %5 = vector.load %arg2[%c19_5, %c96] : memref<20x288xf32, #tpu.memory_space<vmem>>, vector<1x64xf32>
    %c0_6 = arith.constant 0 : index
    %c0_7 = arith.constant 0 : index
    %6 = vector.load %arg3[%c0_6, %c0_7] : memref<96x288xbf16, #tpu.memory_space<vmem>>, vector<32x96xbf16>
    %c32 = arith.constant 32 : index
    %c0_8 = arith.constant 0 : index
    %7 = vector.load %arg3[%c32, %c0_8] : memref<96x288xbf16, #tpu.memory_space<vmem>>, vector<64x288xbf16>
    %c0_9 = arith.constant 0 : index
    %c0_10 = arith.constant 0 : index
    %c0_11 = arith.constant 0 : index
    %8 = vector.load %arg0[%c0_9, %c0_10, %c0_11] : memref<8x8x16xf32, #tpu.memory_space<vmem>>, vector<8x8x16xf32>
    %9 = vector.shape_cast %8 : vector<8x8x16xf32> to vector<64x16xf32>
    %cst = arith.constant dense<0.000000e+00> : vector<64x32xf32>
    %10 = tpu.matmul %9, %0, %cst {dimension_numbers = #tpu.dot_dimension_numbers<[1], [0], [0], [1], [0, 0, 1, 1], [], []>} : vector<64x16xf32>, vector<16x32xf32>, vector<64x32xf32> -> vector<64x32xf32>
    %11 = vector.broadcast %1 : vector<1x32xf32> to vector<64x32xf32>
    %12 = arith.addf %10, %11 : vector<64x32xf32>
    %cst_12 = arith.constant 0.00999999977 : f32
    %13 = vector.broadcast %cst_12 : f32 to vector<64x32xf32>
    %14 = arith.mulf %13, %12 : vector<64x32xf32>
    %15 = arith.maximumf %12, %14 : vector<64x32xf32>
    %16 = arith.truncf %15 : vector<64x32xf32> to vector<64x32xbf16>
    %cst_13 = arith.constant dense<0.000000e+00> : vector<64x96xf32>
    %17 = tpu.matmul %16, %6, %cst_13 {dimension_numbers = #tpu.dot_dimension_numbers<[1], [0], [0], [1], [0, 0, 1, 1], [], []>} : vector<64x32xbf16>, vector<32x96xbf16>, vector<64x96xf32> -> vector<64x96xf32>
    %18 = vector.broadcast %4 : vector<1x96xf32> to vector<64x96xf32>
    %19 = arith.addf %17, %18 : vector<64x96xf32>
    %20 = vector.shape_cast %3 : vector<1x288xf32> to vector<1x288xf32>
    %21 = vector.broadcast %20 : vector<1x288xf32> to vector<8x288xf32>
    %c0_14 = arith.constant 0 : index
    %c0_15 = arith.constant 0 : index
    %c0_16 = arith.constant 0 : index
    %22 = vector.load %arg1[%c0_14, %c0_15, %c0_16] : memref<2x8x32xf32, #tpu.memory_space<vmem>>, vector<1x8x32xf32>
    %23 = vector.shape_cast %22 : vector<1x8x32xf32> to vector<8x32xf32>
    %c1 = arith.constant 1 : index
    %c0_17 = arith.constant 0 : index
    %c0_18 = arith.constant 0 : index
    %24 = vector.load %arg1[%c1, %c0_17, %c0_18] : memref<2x8x32xf32, #tpu.memory_space<vmem>>, vector<1x8x32xf32>
    %25 = vector.shape_cast %24 : vector<1x8x32xf32> to vector<8x32xf32>
    %26 = tpu.concatenate %23, %25 in 1 : vector<8x32xf32>, vector<8x32xf32> -> vector<8x64xf32>
    %27 = arith.truncf %26 : vector<8x64xf32> to vector<8x64xbf16>
    %cst_19 = arith.constant dense<0.000000e+00> : vector<8x288xf32>
    %28 = tpu.matmul %27, %7, %cst_19 {dimension_numbers = #tpu.dot_dimension_numbers<[1], [0], [0], [1], [0, 0, 1, 1], [], []>} : vector<8x64xbf16>, vector<64x288xbf16>, vector<8x288xf32> -> vector<8x288xf32>
    %29 = arith.addf %28, %21 : vector<8x288xf32>
    %30 = vector.extract_strided_slice %19 {offsets = [0, 0], sizes = [8, 96], strides = [1, 1]} : vector<64x96xf32> to vector<8x96xf32>
    %31 = vector.extract_strided_slice %30 {offsets = [0, 0], sizes = [8, 64], strides = [1, 1]} : vector<8x96xf32> to vector<8x64xf32>
    %32 = vector.extract_strided_slice %29 {offsets = [0, 0], sizes = [8, 64], strides = [1, 1]} : vector<8x288xf32> to vector<8x64xf32>
    %33 = arith.addf %31, %32 : vector<8x64xf32>
    %34 = arith.negf %33 : vector<8x64xf32>
    %35 = math.exp %34 : vector<8x64xf32>
    %cst_20 = arith.constant 1.000000e+00 : f32
    %36 = vector.broadcast %cst_20 : f32 to vector<8x64xf32>
    %37 = arith.addf %36, %35 : vector<8x64xf32>
    %38 = arith.divf %36, %37 : vector<8x64xf32>
    %39 = vector.extract_strided_slice %30 {offsets = [0, 64], sizes = [8, 32], strides = [1, 1]} : vector<8x96xf32> to vector<8x32xf32>
    %40 = vector.extract_strided_slice %38 {offsets = [0, 0], sizes = [8, 32], strides = [1, 1]} : vector<8x64xf32> to vector<8x32xf32>
    %41 = vector.extract_strided_slice %29 {offsets = [0, 64], sizes = [8, 32], strides = [1, 1]} : vector<8x288xf32> to vector<8x32xf32>
    %42 = arith.mulf %40, %41 : vector<8x32xf32>
    %43 = arith.addf %39, %42 : vector<8x32xf32>
    %44 = math.tanh %43 : vector<8x32xf32>
    %45 = vector.extract_strided_slice %38 {offsets = [0, 32], sizes = [8, 32], strides = [1, 1]} : vector<8x64xf32> to vector<8x32xf32>
    %cst_21 = arith.constant 1.000000e+00 : f32
    %46 = vector.broadcast %cst_21 : f32 to vector<8x32xf32>
    %47 = arith.subf %46, %45 : vector<8x32xf32>
    %48 = arith.mulf %47, %44 : vector<8x32xf32>
    %49 = arith.mulf %45, %23 : vector<8x32xf32>
    %50 = arith.addf %48, %49 : vector<8x32xf32>
    %51 = tpu.concatenate %50, %25 in 1 : vector<8x32xf32>, vector<8x32xf32> -> vector<8x64xf32>
    %52 = arith.truncf %51 : vector<8x64xf32> to vector<8x64xbf16>
    %cst_22 = arith.constant dense<0.000000e+00> : vector<8x288xf32>
    %53 = tpu.matmul %52, %7, %cst_22 {dimension_numbers = #tpu.dot_dimension_numbers<[1], [0], [0], [1], [0, 0, 1, 1], [], []>} : vector<8x64xbf16>, vector<64x288xbf16>, vector<8x288xf32> -> vector<8x288xf32>
    %54 = arith.addf %53, %21 : vector<8x288xf32>
    %55 = vector.extract_strided_slice %19 {offsets = [8, 0], sizes = [8, 96], strides = [1, 1]} : vector<64x96xf32> to vector<8x96xf32>
    %56 = vector.extract_strided_slice %55 {offsets = [0, 0], sizes = [8, 64], strides = [1, 1]} : vector<8x96xf32> to vector<8x64xf32>
    %57 = vector.extract_strided_slice %54 {offsets = [0, 0], sizes = [8, 64], strides = [1, 1]} : vector<8x288xf32> to vector<8x64xf32>
    %58 = arith.addf %56, %57 : vector<8x64xf32>
    %59 = arith.negf %58 : vector<8x64xf32>
    %60 = math.exp %59 : vector<8x64xf32>
    %cst_23 = arith.constant 1.000000e+00 : f32
    %61 = vector.broadcast %cst_23 : f32 to vector<8x64xf32>
    %62 = arith.addf %61, %60 : vector<8x64xf32>
    %63 = arith.divf %61, %62 : vector<8x64xf32>
    %64 = vector.extract_strided_slice %55 {offsets = [0, 64], sizes = [8, 32], strides = [1, 1]} : vector<8x96xf32> to vector<8x32xf32>
    %65 = vector.extract_strided_slice %63 {offsets = [0, 0], sizes = [8, 32], strides = [1, 1]} : vector<8x64xf32> to vector<8x32xf32>
    %66 = vector.extract_strided_slice %54 {offsets = [0, 64], sizes = [8, 32], strides = [1, 1]} : vector<8x288xf32> to vector<8x32xf32>
    %67 = arith.mulf %65, %66 : vector<8x32xf32>
    %68 = arith.addf %64, %67 : vector<8x32xf32>
    %69 = math.tanh %68 : vector<8x32xf32>
    %70 = vector.extract_strided_slice %63 {offsets = [0, 32], sizes = [8, 32], strides = [1, 1]} : vector<8x64xf32> to vector<8x32xf32>
    %cst_24 = arith.constant 1.000000e+00 : f32
    %71 = vector.broadcast %cst_24 : f32 to vector<8x32xf32>
    %72 = arith.subf %71, %70 : vector<8x32xf32>
    %73 = arith.mulf %72, %69 : vector<8x32xf32>
    %74 = arith.mulf %70, %50 : vector<8x32xf32>
    %75 = arith.addf %73, %74 : vector<8x32xf32>
    %76 = vector.extract_strided_slice %54 {offsets = [0, 96], sizes = [8, 64], strides = [1, 1]} : vector<8x288xf32> to vector<8x64xf32>
    %77 = vector.extract_strided_slice %54 {offsets = [0, 192], sizes = [8, 64], strides = [1, 1]} : vector<8x288xf32> to vector<8x64xf32>
    %78 = arith.addf %76, %77 : vector<8x64xf32>
    %79 = arith.negf %78 : vector<8x64xf32>
    %80 = math.exp %79 : vector<8x64xf32>
    %cst_25 = arith.constant 1.000000e+00 : f32
    %81 = vector.broadcast %cst_25 : f32 to vector<8x64xf32>
    %82 = arith.addf %81, %80 : vector<8x64xf32>
    %83 = arith.divf %81, %82 : vector<8x64xf32>
    %84 = vector.extract_strided_slice %54 {offsets = [0, 160], sizes = [8, 32], strides = [1, 1]} : vector<8x288xf32> to vector<8x32xf32>
    %85 = vector.extract_strided_slice %83 {offsets = [0, 0], sizes = [8, 32], strides = [1, 1]} : vector<8x64xf32> to vector<8x32xf32>
    %86 = vector.extract_strided_slice %54 {offsets = [0, 256], sizes = [8, 32], strides = [1, 1]} : vector<8x288xf32> to vector<8x32xf32>
    %87 = arith.mulf %85, %86 : vector<8x32xf32>
    %88 = arith.addf %84, %87 : vector<8x32xf32>
    %89 = math.tanh %88 : vector<8x32xf32>
    %90 = vector.extract_strided_slice %83 {offsets = [0, 32], sizes = [8, 32], strides = [1, 1]} : vector<8x64xf32> to vector<8x32xf32>
    %cst_26 = arith.constant 1.000000e+00 : f32
    %91 = vector.broadcast %cst_26 : f32 to vector<8x32xf32>
    %92 = arith.subf %91, %90 : vector<8x32xf32>
    %93 = arith.mulf %92, %89 : vector<8x32xf32>
    %94 = arith.mulf %90, %25 : vector<8x32xf32>
    %95 = arith.addf %93, %94 : vector<8x32xf32>
    %c0_27 = arith.constant 0 : index
    %c0_28 = arith.constant 0 : index
    %96 = vector.load %arg6[%c0_27, %c0_28] : memref<64x32xf32, #tpu.memory_space<vmem>>, vector<8x32xf32>
    tpu.vector_store %arg6[%c0_27, %c0_28], %95 {strides = array<i32>} : memref<64x32xf32, #tpu.memory_space<vmem>>, vector<8x32xf32>,
    %97 = tpu.concatenate %75, %95 in 1 : vector<8x32xf32>, vector<8x32xf32> -> vector<8x64xf32>
    %98 = arith.truncf %97 : vector<8x64xf32> to vector<8x64xbf16>
    %cst_29 = arith.constant dense<0.000000e+00> : vector<8x288xf32>
    %99 = tpu.matmul %98, %7, %cst_29 {dimension_numbers = #tpu.dot_dimension_numbers<[1], [0], [0], [1], [0, 0, 1, 1], [], []>} : vector<8x64xbf16>, vector<64x288xbf16>, vector<8x288xf32> -> vector<8x288xf32>
    %100 = arith.addf %99, %21 : vector<8x288xf32>
    %101 = vector.extract_strided_slice %19 {offsets = [16, 0], sizes = [8, 96], strides = [1, 1]} : vector<64x96xf32> to vector<8x96xf32>
    %102 = vector.extract_strided_slice %101 {offsets = [0, 0], sizes = [8, 64], strides = [1, 1]} : vector<8x96xf32> to vector<8x64xf32>
    %103 = vector.extract_strided_slice %100 {offsets = [0, 0], sizes = [8, 64], strides = [1, 1]} : vector<8x288xf32> to vector<8x64xf32>
    %104 = arith.addf %102, %103 : vector<8x64xf32>
    %105 = arith.negf %104 : vector<8x64xf32>
    %106 = math.exp %105 : vector<8x64xf32>
    %cst_30 = arith.constant 1.000000e+00 : f32
    %107 = vector.broadcast %cst_30 : f32 to vector<8x64xf32>
    %108 = arith.addf %107, %106 : vector<8x64xf32>
    %109 = arith.divf %107, %108 : vector<8x64xf32>
    %110 = vector.extract_strided_slice %101 {offsets = [0, 64], sizes = [8, 32], strides = [1, 1]} : vector<8x96xf32> to vector<8x32xf32>
    %111 = vector.extract_strided_slice %109 {offsets = [0, 0], sizes = [8, 32], strides = [1, 1]} : vector<8x64xf32> to vector<8x32xf32>
    %112 = vector.extract_strided_slice %100 {offsets = [0, 64], sizes = [8, 32], strides = [1, 1]} : vector<8x288xf32> to vector<8x32xf32>
    %113 = arith.mulf %111, %112 : vector<8x32xf32>
    %114 = arith.addf %110, %113 : vector<8x32xf32>
    %115 = math.tanh %114 : vector<8x32xf32>
    %116 = vector.extract_strided_slice %109 {offsets = [0, 32], sizes = [8, 32], strides = [1, 1]} : vector<8x64xf32> to vector<8x32xf32>
    %cst_31 = arith.constant 1.000000e+00 : f32
    %117 = vector.broadcast %cst_31 : f32 to vector<8x32xf32>
    %118 = arith.subf %117, %116 : vector<8x32xf32>
    %119 = arith.mulf %118, %115 : vector<8x32xf32>
    %120 = arith.mulf %116, %75 : vector<8x32xf32>
    %121 = arith.addf %119, %120 : vector<8x32xf32>
    %122 = vector.extract_strided_slice %100 {offsets = [0, 96], sizes = [8, 64], strides = [1, 1]} : vector<8x288xf32> to vector<8x64xf32>
    %123 = vector.extract_strided_slice %100 {offsets = [0, 192], sizes = [8, 64], strides = [1, 1]} : vector<8x288xf32> to vector<8x64xf32>
    %124 = arith.addf %122, %123 : vector<8x64xf32>
    %125 = arith.negf %124 : vector<8x64xf32>
    %126 = math.exp %125 : vector<8x64xf32>
    %cst_32 = arith.constant 1.000000e+00 : f32
    %127 = vector.broadcast %cst_32 : f32 to vector<8x64xf32>
    %128 = arith.addf %127, %126 : vector<8x64xf32>
    %129 = arith.divf %127, %128 : vector<8x64xf32>
    %130 = vector.extract_strided_slice %100 {offsets = [0, 160], sizes = [8, 32], strides = [1, 1]} : vector<8x288xf32> to vector<8x32xf32>
    %131 = vector.extract_strided_slice %129 {offsets = [0, 0], sizes = [8, 32], strides = [1, 1]} : vector<8x64xf32> to vector<8x32xf32>
    %132 = vector.extract_strided_slice %100 {offsets = [0, 256], sizes = [8, 32], strides = [1, 1]} : vector<8x288xf32> to vector<8x32xf32>
    %133 = arith.mulf %131, %132 : vector<8x32xf32>
    %134 = arith.addf %130, %133 : vector<8x32xf32>
    %135 = math.tanh %134 : vector<8x32xf32>
    %136 = vector.extract_strided_slice %129 {offsets = [0, 32], sizes = [8, 32], strides = [1, 1]} : vector<8x64xf32> to vector<8x32xf32>
    %cst_33 = arith.constant 1.000000e+00 : f32
    %137 = vector.broadcast %cst_33 : f32 to vector<8x32xf32>
    %138 = arith.subf %137, %136 : vector<8x32xf32>
    %139 = arith.mulf %138, %135 : vector<8x32xf32>
    %140 = arith.mulf %136, %95 : vector<8x32xf32>
    %141 = arith.addf %139, %140 : vector<8x32xf32>
    %c8 = arith.constant 8 : index
    %c0_34 = arith.constant 0 : index
    %142 = vector.load %arg6[%c8, %c0_34] : memref<64x32xf32, #tpu.memory_space<vmem>>, vector<8x32xf32>
    tpu.vector_store %arg6[%c8, %c0_34], %141 {strides = array<i32>} : memref<64x32xf32, #tpu.memory_space<vmem>>, vector<8x32xf32>,
    %143 = tpu.concatenate %121, %141 in 1 : vector<8x32xf32>, vector<8x32xf32> -> vector<8x64xf32>
    %144 = arith.truncf %143 : vector<8x64xf32> to vector<8x64xbf16>
    %cst_35 = arith.constant dense<0.000000e+00> : vector<8x288xf32>
    %145 = tpu.matmul %144, %7, %cst_35 {dimension_numbers = #tpu.dot_dimension_numbers<[1], [0], [0], [1], [0, 0, 1, 1], [], []>} : vector<8x64xbf16>, vector<64x288xbf16>, vector<8x288xf32> -> vector<8x288xf32>
    %146 = arith.addf %145, %21 : vector<8x288xf32>
    %147 = vector.extract_strided_slice %19 {offsets = [24, 0], sizes = [8, 96], strides = [1, 1]} : vector<64x96xf32> to vector<8x96xf32>
    %148 = vector.extract_strided_slice %147 {offsets = [0, 0], sizes = [8, 64], strides = [1, 1]} : vector<8x96xf32> to vector<8x64xf32>
    %149 = vector.extract_strided_slice %146 {offsets = [0, 0], sizes = [8, 64], strides = [1, 1]} : vector<8x288xf32> to vector<8x64xf32>
    %150 = arith.addf %148, %149 : vector<8x64xf32>
    %151 = arith.negf %150 : vector<8x64xf32>
    %152 = math.exp %151 : vector<8x64xf32>
    %cst_36 = arith.constant 1.000000e+00 : f32
    %153 = vector.broadcast %cst_36 : f32 to vector<8x64xf32>
    %154 = arith.addf %153, %152 : vector<8x64xf32>
    %155 = arith.divf %153, %154 : vector<8x64xf32>
    %156 = vector.extract_strided_slice %147 {offsets = [0, 64], sizes = [8, 32], strides = [1, 1]} : vector<8x96xf32> to vector<8x32xf32>
    %157 = vector.extract_strided_slice %155 {offsets = [0, 0], sizes = [8, 32], strides = [1, 1]} : vector<8x64xf32> to vector<8x32xf32>
    %158 = vector.extract_strided_slice %146 {offsets = [0, 64], sizes = [8, 32], strides = [1, 1]} : vector<8x288xf32> to vector<8x32xf32>
    %159 = arith.mulf %157, %158 : vector<8x32xf32>
    %160 = arith.addf %156, %159 : vector<8x32xf32>
    %161 = math.tanh %160 : vector<8x32xf32>
    %162 = vector.extract_strided_slice %155 {offsets = [0, 32], sizes = [8, 32], strides = [1, 1]} : vector<8x64xf32> to vector<8x32xf32>
    %cst_37 = arith.constant 1.000000e+00 : f32
    %163 = vector.broadcast %cst_37 : f32 to vector<8x32xf32>
    %164 = arith.subf %163, %162 : vector<8x32xf32>
    %165 = arith.mulf %164, %161 : vector<8x32xf32>
    %166 = arith.mulf %162, %121 : vector<8x32xf32>
    %167 = arith.addf %165, %166 : vector<8x32xf32>
    %168 = vector.extract_strided_slice %146 {offsets = [0, 96], sizes = [8, 64], strides = [1, 1]} : vector<8x288xf32> to vector<8x64xf32>
    %169 = vector.extract_strided_slice %146 {offsets = [0, 192], sizes = [8, 64], strides = [1, 1]} : vector<8x288xf32> to vector<8x64xf32>
    %170 = arith.addf %168, %169 : vector<8x64xf32>
    %171 = arith.negf %170 : vector<8x64xf32>
    %172 = math.exp %171 : vector<8x64xf32>
    %cst_38 = arith.constant 1.000000e+00 : f32
    %173 = vector.broadcast %cst_38 : f32 to vector<8x64xf32>
    %174 = arith.addf %173, %172 : vector<8x64xf32>
    %175 = arith.divf %173, %174 : vector<8x64xf32>
    %176 = vector.extract_strided_slice %146 {offsets = [0, 160], sizes = [8, 32], strides = [1, 1]} : vector<8x288xf32> to vector<8x32xf32>
    %177 = vector.extract_strided_slice %175 {offsets = [0, 0], sizes = [8, 32], strides = [1, 1]} : vector<8x64xf32> to vector<8x32xf32>
    %178 = vector.extract_strided_slice %146 {offsets = [0, 256], sizes = [8, 32], strides = [1, 1]} : vector<8x288xf32> to vector<8x32xf32>
    %179 = arith.mulf %177, %178 : vector<8x32xf32>
    %180 = arith.addf %176, %179 : vector<8x32xf32>
    %181 = math.tanh %180 : vector<8x32xf32>
    %182 = vector.extract_strided_slice %175 {offsets = [0, 32], sizes = [8, 32], strides = [1, 1]} : vector<8x64xf32> to vector<8x32xf32>
    %cst_39 = arith.constant 1.000000e+00 : f32
    %183 = vector.broadcast %cst_39 : f32 to vector<8x32xf32>
    %184 = arith.subf %183, %182 : vector<8x32xf32>
    %185 = arith.mulf %184, %181 : vector<8x32xf32>
    %186 = arith.mulf %182, %141 : vector<8x32xf32>
    %187 = arith.addf %185, %186 : vector<8x32xf32>
    %c16_40 = arith.constant 16 : index
    %c0_41 = arith.constant 0 : index
    %188 = vector.load %arg6[%c16_40, %c0_41] : memref<64x32xf32, #tpu.memory_space<vmem>>, vector<8x32xf32>
    tpu.vector_store %arg6[%c16_40, %c0_41], %187 {strides = array<i32>} : memref<64x32xf32, #tpu.memory_space<vmem>>, vector<8x32xf32>,
    %189 = tpu.concatenate %167, %187 in 1 : vector<8x32xf32>, vector<8x32xf32> -> vector<8x64xf32>
    %190 = arith.truncf %189 : vector<8x64xf32> to vector<8x64xbf16>
    %cst_42 = arith.constant dense<0.000000e+00> : vector<8x288xf32>
    %191 = tpu.matmul %190, %7, %cst_42 {dimension_numbers = #tpu.dot_dimension_numbers<[1], [0], [0], [1], [0, 0, 1, 1], [], []>} : vector<8x64xbf16>, vector<64x288xbf16>, vector<8x288xf32> -> vector<8x288xf32>
    %192 = arith.addf %191, %21 : vector<8x288xf32>
    %193 = vector.extract_strided_slice %19 {offsets = [32, 0], sizes = [8, 96], strides = [1, 1]} : vector<64x96xf32> to vector<8x96xf32>
    %194 = vector.extract_strided_slice %193 {offsets = [0, 0], sizes = [8, 64], strides = [1, 1]} : vector<8x96xf32> to vector<8x64xf32>
    %195 = vector.extract_strided_slice %192 {offsets = [0, 0], sizes = [8, 64], strides = [1, 1]} : vector<8x288xf32> to vector<8x64xf32>
    %196 = arith.addf %194, %195 : vector<8x64xf32>
    %197 = arith.negf %196 : vector<8x64xf32>
    %198 = math.exp %197 : vector<8x64xf32>
    %cst_43 = arith.constant 1.000000e+00 : f32
    %199 = vector.broadcast %cst_43 : f32 to vector<8x64xf32>
    %200 = arith.addf %199, %198 : vector<8x64xf32>
    %201 = arith.divf %199, %200 : vector<8x64xf32>
    %202 = vector.extract_strided_slice %193 {offsets = [0, 64], sizes = [8, 32], strides = [1, 1]} : vector<8x96xf32> to vector<8x32xf32>
    %203 = vector.extract_strided_slice %201 {offsets = [0, 0], sizes = [8, 32], strides = [1, 1]} : vector<8x64xf32> to vector<8x32xf32>
    %204 = vector.extract_strided_slice %192 {offsets = [0, 64], sizes = [8, 32], strides = [1, 1]} : vector<8x288xf32> to vector<8x32xf32>
    %205 = arith.mulf %203, %204 : vector<8x32xf32>
    %206 = arith.addf %202, %205 : vector<8x32xf32>
    %207 = math.tanh %206 : vector<8x32xf32>
    %208 = vector.extract_strided_slice %201 {offsets = [0, 32], sizes = [8, 32], strides = [1, 1]} : vector<8x64xf32> to vector<8x32xf32>
    %cst_44 = arith.constant 1.000000e+00 : f32
    %209 = vector.broadcast %cst_44 : f32 to vector<8x32xf32>
    %210 = arith.subf %209, %208 : vector<8x32xf32>
    %211 = arith.mulf %210, %207 : vector<8x32xf32>
    %212 = arith.mulf %208, %167 : vector<8x32xf32>
    %213 = arith.addf %211, %212 : vector<8x32xf32>
    %214 = vector.extract_strided_slice %192 {offsets = [0, 96], sizes = [8, 64], strides = [1, 1]} : vector<8x288xf32> to vector<8x64xf32>
    %215 = vector.extract_strided_slice %192 {offsets = [0, 192], sizes = [8, 64], strides = [1, 1]} : vector<8x288xf32> to vector<8x64xf32>
    %216 = arith.addf %214, %215 : vector<8x64xf32>
    %217 = arith.negf %216 : vector<8x64xf32>
    %218 = math.exp %217 : vector<8x64xf32>
    %cst_45 = arith.constant 1.000000e+00 : f32
    %219 = vector.broadcast %cst_45 : f32 to vector<8x64xf32>
    %220 = arith.addf %219, %218 : vector<8x64xf32>
    %221 = arith.divf %219, %220 : vector<8x64xf32>
    %222 = vector.extract_strided_slice %192 {offsets = [0, 160], sizes = [8, 32], strides = [1, 1]} : vector<8x288xf32> to vector<8x32xf32>
    %223 = vector.extract_strided_slice %221 {offsets = [0, 0], sizes = [8, 32], strides = [1, 1]} : vector<8x64xf32> to vector<8x32xf32>
    %224 = vector.extract_strided_slice %192 {offsets = [0, 256], sizes = [8, 32], strides = [1, 1]} : vector<8x288xf32> to vector<8x32xf32>
    %225 = arith.mulf %223, %224 : vector<8x32xf32>
    %226 = arith.addf %222, %225 : vector<8x32xf32>
    %227 = math.tanh %226 : vector<8x32xf32>
    %228 = vector.extract_strided_slice %221 {offsets = [0, 32], sizes = [8, 32], strides = [1, 1]} : vector<8x64xf32> to vector<8x32xf32>
    %cst_46 = arith.constant 1.000000e+00 : f32
    %229 = vector.broadcast %cst_46 : f32 to vector<8x32xf32>
    %230 = arith.subf %229, %228 : vector<8x32xf32>
    %231 = arith.mulf %230, %227 : vector<8x32xf32>
    %232 = arith.mulf %228, %187 : vector<8x32xf32>
    %233 = arith.addf %231, %232 : vector<8x32xf32>
    %c24 = arith.constant 24 : index
    %c0_47 = arith.constant 0 : index
    %234 = vector.load %arg6[%c24, %c0_47] : memref<64x32xf32, #tpu.memory_space<vmem>>, vector<8x32xf32>
    tpu.vector_store %arg6[%c24, %c0_47], %233 {strides = array<i32>} : memref<64x32xf32, #tpu.memory_space<vmem>>, vector<8x32xf32>,
    %235 = tpu.concatenate %213, %233 in 1 : vector<8x32xf32>, vector<8x32xf32> -> vector<8x64xf32>
    %236 = arith.truncf %235 : vector<8x64xf32> to vector<8x64xbf16>
    %cst_48 = arith.constant dense<0.000000e+00> : vector<8x288xf32>
    %237 = tpu.matmul %236, %7, %cst_48 {dimension_numbers = #tpu.dot_dimension_numbers<[1], [0], [0], [1], [0, 0, 1, 1], [], []>} : vector<8x64xbf16>, vector<64x288xbf16>, vector<8x288xf32> -> vector<8x288xf32>
    %238 = arith.addf %237, %21 : vector<8x288xf32>
    %239 = vector.extract_strided_slice %19 {offsets = [40, 0], sizes = [8, 96], strides = [1, 1]} : vector<64x96xf32> to vector<8x96xf32>
    %240 = vector.extract_strided_slice %239 {offsets = [0, 0], sizes = [8, 64], strides = [1, 1]} : vector<8x96xf32> to vector<8x64xf32>
    %241 = vector.extract_strided_slice %238 {offsets = [0, 0], sizes = [8, 64], strides = [1, 1]} : vector<8x288xf32> to vector<8x64xf32>
    %242 = arith.addf %240, %241 : vector<8x64xf32>
    %243 = arith.negf %242 : vector<8x64xf32>
    %244 = math.exp %243 : vector<8x64xf32>
    %cst_49 = arith.constant 1.000000e+00 : f32
    %245 = vector.broadcast %cst_49 : f32 to vector<8x64xf32>
    %246 = arith.addf %245, %244 : vector<8x64xf32>
    %247 = arith.divf %245, %246 : vector<8x64xf32>
    %248 = vector.extract_strided_slice %239 {offsets = [0, 64], sizes = [8, 32], strides = [1, 1]} : vector<8x96xf32> to vector<8x32xf32>
    %249 = vector.extract_strided_slice %247 {offsets = [0, 0], sizes = [8, 32], strides = [1, 1]} : vector<8x64xf32> to vector<8x32xf32>
    %250 = vector.extract_strided_slice %238 {offsets = [0, 64], sizes = [8, 32], strides = [1, 1]} : vector<8x288xf32> to vector<8x32xf32>
    %251 = arith.mulf %249, %250 : vector<8x32xf32>
    %252 = arith.addf %248, %251 : vector<8x32xf32>
    %253 = math.tanh %252 : vector<8x32xf32>
    %254 = vector.extract_strided_slice %247 {offsets = [0, 32], sizes = [8, 32], strides = [1, 1]} : vector<8x64xf32> to vector<8x32xf32>
    %cst_50 = arith.constant 1.000000e+00 : f32
    %255 = vector.broadcast %cst_50 : f32 to vector<8x32xf32>
    %256 = arith.subf %255, %254 : vector<8x32xf32>
    %257 = arith.mulf %256, %253 : vector<8x32xf32>
    %258 = arith.mulf %254, %213 : vector<8x32xf32>
    %259 = arith.addf %257, %258 : vector<8x32xf32>
    %260 = vector.extract_strided_slice %238 {offsets = [0, 96], sizes = [8, 64], strides = [1, 1]} : vector<8x288xf32> to vector<8x64xf32>
    %261 = vector.extract_strided_slice %238 {offsets = [0, 192], sizes = [8, 64], strides = [1, 1]} : vector<8x288xf32> to vector<8x64xf32>
    %262 = arith.addf %260, %261 : vector<8x64xf32>
    %263 = arith.negf %262 : vector<8x64xf32>
    %264 = math.exp %263 : vector<8x64xf32>
    %cst_51 = arith.constant 1.000000e+00 : f32
    %265 = vector.broadcast %cst_51 : f32 to vector<8x64xf32>
    %266 = arith.addf %265, %264 : vector<8x64xf32>
    %267 = arith.divf %265, %266 : vector<8x64xf32>
    %268 = vector.extract_strided_slice %238 {offsets = [0, 160], sizes = [8, 32], strides = [1, 1]} : vector<8x288xf32> to vector<8x32xf32>
    %269 = vector.extract_strided_slice %267 {offsets = [0, 0], sizes = [8, 32], strides = [1, 1]} : vector<8x64xf32> to vector<8x32xf32>
    %270 = vector.extract_strided_slice %238 {offsets = [0, 256], sizes = [8, 32], strides = [1, 1]} : vector<8x288xf32> to vector<8x32xf32>
    %271 = arith.mulf %269, %270 : vector<8x32xf32>
    %272 = arith.addf %268, %271 : vector<8x32xf32>
    %273 = math.tanh %272 : vector<8x32xf32>
    %274 = vector.extract_strided_slice %267 {offsets = [0, 32], sizes = [8, 32], strides = [1, 1]} : vector<8x64xf32> to vector<8x32xf32>
    %cst_52 = arith.constant 1.000000e+00 : f32
    %275 = vector.broadcast %cst_52 : f32 to vector<8x32xf32>
    %276 = arith.subf %275, %274 : vector<8x32xf32>
    %277 = arith.mulf %276, %273 : vector<8x32xf32>
    %278 = arith.mulf %274, %233 : vector<8x32xf32>
    %279 = arith.addf %277, %278 : vector<8x32xf32>
    %c32_53 = arith.constant 32 : index
    %c0_54 = arith.constant 0 : index
    %280 = vector.load %arg6[%c32_53, %c0_54] : memref<64x32xf32, #tpu.memory_space<vmem>>, vector<8x32xf32>
    tpu.vector_store %arg6[%c32_53, %c0_54], %279 {strides = array<i32>} : memref<64x32xf32, #tpu.memory_space<vmem>>, vector<8x32xf32>,
    %281 = tpu.concatenate %259, %279 in 1 : vector<8x32xf32>, vector<8x32xf32> -> vector<8x64xf32>
    %282 = arith.truncf %281 : vector<8x64xf32> to vector<8x64xbf16>
    %cst_55 = arith.constant dense<0.000000e+00> : vector<8x288xf32>
    %283 = tpu.matmul %282, %7, %cst_55 {dimension_numbers = #tpu.dot_dimension_numbers<[1], [0], [0], [1], [0, 0, 1, 1], [], []>} : vector<8x64xbf16>, vector<64x288xbf16>, vector<8x288xf32> -> vector<8x288xf32>
    %284 = arith.addf %283, %21 : vector<8x288xf32>
    %285 = vector.extract_strided_slice %19 {offsets = [48, 0], sizes = [8, 96], strides = [1, 1]} : vector<64x96xf32> to vector<8x96xf32>
    %286 = vector.extract_strided_slice %285 {offsets = [0, 0], sizes = [8, 64], strides = [1, 1]} : vector<8x96xf32> to vector<8x64xf32>
    %287 = vector.extract_strided_slice %284 {offsets = [0, 0], sizes = [8, 64], strides = [1, 1]} : vector<8x288xf32> to vector<8x64xf32>
    %288 = arith.addf %286, %287 : vector<8x64xf32>
    %289 = arith.negf %288 : vector<8x64xf32>
    %290 = math.exp %289 : vector<8x64xf32>
    %cst_56 = arith.constant 1.000000e+00 : f32
    %291 = vector.broadcast %cst_56 : f32 to vector<8x64xf32>
    %292 = arith.addf %291, %290 : vector<8x64xf32>
    %293 = arith.divf %291, %292 : vector<8x64xf32>
    %294 = vector.extract_strided_slice %285 {offsets = [0, 64], sizes = [8, 32], strides = [1, 1]} : vector<8x96xf32> to vector<8x32xf32>
    %295 = vector.extract_strided_slice %293 {offsets = [0, 0], sizes = [8, 32], strides = [1, 1]} : vector<8x64xf32> to vector<8x32xf32>
    %296 = vector.extract_strided_slice %284 {offsets = [0, 64], sizes = [8, 32], strides = [1, 1]} : vector<8x288xf32> to vector<8x32xf32>
    %297 = arith.mulf %295, %296 : vector<8x32xf32>
    %298 = arith.addf %294, %297 : vector<8x32xf32>
    %299 = math.tanh %298 : vector<8x32xf32>
    %300 = vector.extract_strided_slice %293 {offsets = [0, 32], sizes = [8, 32], strides = [1, 1]} : vector<8x64xf32> to vector<8x32xf32>
    %cst_57 = arith.constant 1.000000e+00 : f32
    %301 = vector.broadcast %cst_57 : f32 to vector<8x32xf32>
    %302 = arith.subf %301, %300 : vector<8x32xf32>
    %303 = arith.mulf %302, %299 : vector<8x32xf32>
    %304 = arith.mulf %300, %259 : vector<8x32xf32>
    %305 = arith.addf %303, %304 : vector<8x32xf32>
    %306 = vector.extract_strided_slice %284 {offsets = [0, 96], sizes = [8, 64], strides = [1, 1]} : vector<8x288xf32> to vector<8x64xf32>
    %307 = vector.extract_strided_slice %284 {offsets = [0, 192], sizes = [8, 64], strides = [1, 1]} : vector<8x288xf32> to vector<8x64xf32>
    %308 = arith.addf %306, %307 : vector<8x64xf32>
    %309 = arith.negf %308 : vector<8x64xf32>
    %310 = math.exp %309 : vector<8x64xf32>
    %cst_58 = arith.constant 1.000000e+00 : f32
    %311 = vector.broadcast %cst_58 : f32 to vector<8x64xf32>
    %312 = arith.addf %311, %310 : vector<8x64xf32>
    %313 = arith.divf %311, %312 : vector<8x64xf32>
    %314 = vector.extract_strided_slice %284 {offsets = [0, 160], sizes = [8, 32], strides = [1, 1]} : vector<8x288xf32> to vector<8x32xf32>
    %315 = vector.extract_strided_slice %313 {offsets = [0, 0], sizes = [8, 32], strides = [1, 1]} : vector<8x64xf32> to vector<8x32xf32>
    %316 = vector.extract_strided_slice %284 {offsets = [0, 256], sizes = [8, 32], strides = [1, 1]} : vector<8x288xf32> to vector<8x32xf32>
    %317 = arith.mulf %315, %316 : vector<8x32xf32>
    %318 = arith.addf %314, %317 : vector<8x32xf32>
    %319 = math.tanh %318 : vector<8x32xf32>
    %320 = vector.extract_strided_slice %313 {offsets = [0, 32], sizes = [8, 32], strides = [1, 1]} : vector<8x64xf32> to vector<8x32xf32>
    %cst_59 = arith.constant 1.000000e+00 : f32
    %321 = vector.broadcast %cst_59 : f32 to vector<8x32xf32>
    %322 = arith.subf %321, %320 : vector<8x32xf32>
    %323 = arith.mulf %322, %319 : vector<8x32xf32>
    %324 = arith.mulf %320, %279 : vector<8x32xf32>
    %325 = arith.addf %323, %324 : vector<8x32xf32>
    %c40 = arith.constant 40 : index
    %c0_60 = arith.constant 0 : index
    %326 = vector.load %arg6[%c40, %c0_60] : memref<64x32xf32, #tpu.memory_space<vmem>>, vector<8x32xf32>
    tpu.vector_store %arg6[%c40, %c0_60], %325 {strides = array<i32>} : memref<64x32xf32, #tpu.memory_space<vmem>>, vector<8x32xf32>,
    %327 = tpu.concatenate %305, %325 in 1 : vector<8x32xf32>, vector<8x32xf32> -> vector<8x64xf32>
    %328 = arith.truncf %327 : vector<8x64xf32> to vector<8x64xbf16>
    %cst_61 = arith.constant dense<0.000000e+00> : vector<8x288xf32>
    %329 = tpu.matmul %328, %7, %cst_61 {dimension_numbers = #tpu.dot_dimension_numbers<[1], [0], [0], [1], [0, 0, 1, 1], [], []>} : vector<8x64xbf16>, vector<64x288xbf16>, vector<8x288xf32> -> vector<8x288xf32>
    %330 = arith.addf %329, %21 : vector<8x288xf32>
    %331 = vector.extract_strided_slice %19 {offsets = [56, 0], sizes = [8, 96], strides = [1, 1]} : vector<64x96xf32> to vector<8x96xf32>
    %332 = vector.extract_strided_slice %331 {offsets = [0, 0], sizes = [8, 64], strides = [1, 1]} : vector<8x96xf32> to vector<8x64xf32>
    %333 = vector.extract_strided_slice %330 {offsets = [0, 0], sizes = [8, 64], strides = [1, 1]} : vector<8x288xf32> to vector<8x64xf32>
    %334 = arith.addf %332, %333 : vector<8x64xf32>
    %335 = arith.negf %334 : vector<8x64xf32>
    %336 = math.exp %335 : vector<8x64xf32>
    %cst_62 = arith.constant 1.000000e+00 : f32
    %337 = vector.broadcast %cst_62 : f32 to vector<8x64xf32>
    %338 = arith.addf %337, %336 : vector<8x64xf32>
    %339 = arith.divf %337, %338 : vector<8x64xf32>
    %340 = vector.extract_strided_slice %331 {offsets = [0, 64], sizes = [8, 32], strides = [1, 1]} : vector<8x96xf32> to vector<8x32xf32>
    %341 = vector.extract_strided_slice %339 {offsets = [0, 0], sizes = [8, 32], strides = [1, 1]} : vector<8x64xf32> to vector<8x32xf32>
    %342 = vector.extract_strided_slice %330 {offsets = [0, 64], sizes = [8, 32], strides = [1, 1]} : vector<8x288xf32> to vector<8x32xf32>
    %343 = arith.mulf %341, %342 : vector<8x32xf32>
    %344 = arith.addf %340, %343 : vector<8x32xf32>
    %345 = math.tanh %344 : vector<8x32xf32>
    %346 = vector.extract_strided_slice %339 {offsets = [0, 32], sizes = [8, 32], strides = [1, 1]} : vector<8x64xf32> to vector<8x32xf32>
    %cst_63 = arith.constant 1.000000e+00 : f32
    %347 = vector.broadcast %cst_63 : f32 to vector<8x32xf32>
    %348 = arith.subf %347, %346 : vector<8x32xf32>
    %349 = arith.mulf %348, %345 : vector<8x32xf32>
    %350 = arith.mulf %346, %305 : vector<8x32xf32>
    %351 = arith.addf %349, %350 : vector<8x32xf32>
    %352 = vector.extract_strided_slice %330 {offsets = [0, 96], sizes = [8, 64], strides = [1, 1]} : vector<8x288xf32> to vector<8x64xf32>
    %353 = vector.extract_strided_slice %330 {offsets = [0, 192], sizes = [8, 64], strides = [1, 1]} : vector<8x288xf32> to vector<8x64xf32>
    %354 = arith.addf %352, %353 : vector<8x64xf32>
    %355 = arith.negf %354 : vector<8x64xf32>
    %356 = math.exp %355 : vector<8x64xf32>
    %cst_64 = arith.constant 1.000000e+00 : f32
    %357 = vector.broadcast %cst_64 : f32 to vector<8x64xf32>
    %358 = arith.addf %357, %356 : vector<8x64xf32>
    %359 = arith.divf %357, %358 : vector<8x64xf32>
    %360 = vector.extract_strided_slice %330 {offsets = [0, 160], sizes = [8, 32], strides = [1, 1]} : vector<8x288xf32> to vector<8x32xf32>
    %361 = vector.extract_strided_slice %359 {offsets = [0, 0], sizes = [8, 32], strides = [1, 1]} : vector<8x64xf32> to vector<8x32xf32>
    %362 = vector.extract_strided_slice %330 {offsets = [0, 256], sizes = [8, 32], strides = [1, 1]} : vector<8x288xf32> to vector<8x32xf32>
    %363 = arith.mulf %361, %362 : vector<8x32xf32>
    %364 = arith.addf %360, %363 : vector<8x32xf32>
    %365 = math.tanh %364 : vector<8x32xf32>
    %366 = vector.extract_strided_slice %359 {offsets = [0, 32], sizes = [8, 32], strides = [1, 1]} : vector<8x64xf32> to vector<8x32xf32>
    %cst_65 = arith.constant 1.000000e+00 : f32
    %367 = vector.broadcast %cst_65 : f32 to vector<8x32xf32>
    %368 = arith.subf %367, %366 : vector<8x32xf32>
    %369 = arith.mulf %368, %365 : vector<8x32xf32>
    %370 = arith.mulf %366, %325 : vector<8x32xf32>
    %371 = arith.addf %369, %370 : vector<8x32xf32>
    %c48 = arith.constant 48 : index
    %c0_66 = arith.constant 0 : index
    %372 = vector.load %arg6[%c48, %c0_66] : memref<64x32xf32, #tpu.memory_space<vmem>>, vector<8x32xf32>
    tpu.vector_store %arg6[%c48, %c0_66], %371 {strides = array<i32>} : memref<64x32xf32, #tpu.memory_space<vmem>>, vector<8x32xf32>,
    %373 = tpu.concatenate %351, %371 in 1 : vector<8x32xf32>, vector<8x32xf32> -> vector<8x64xf32>
    %374 = arith.truncf %373 : vector<8x64xf32> to vector<8x64xbf16>
    %cst_67 = arith.constant dense<0.000000e+00> : vector<8x288xf32>
    %375 = tpu.matmul %374, %7, %cst_67 {dimension_numbers = #tpu.dot_dimension_numbers<[1], [0], [0], [1], [0, 0, 1, 1], [], []>} : vector<8x64xbf16>, vector<64x288xbf16>, vector<8x288xf32> -> vector<8x288xf32>
    %376 = arith.addf %375, %21 : vector<8x288xf32>
    %377 = vector.extract_strided_slice %376 {offsets = [0, 96], sizes = [8, 64], strides = [1, 1]} : vector<8x288xf32> to vector<8x64xf32>
    %378 = vector.extract_strided_slice %376 {offsets = [0, 192], sizes = [8, 64], strides = [1, 1]} : vector<8x288xf32> to vector<8x64xf32>
    %379 = arith.addf %377, %378 : vector<8x64xf32>
    %380 = arith.negf %379 : vector<8x64xf32>
    %381 = math.exp %380 : vector<8x64xf32>
    %cst_68 = arith.constant 1.000000e+00 : f32
    %382 = vector.broadcast %cst_68 : f32 to vector<8x64xf32>
    %383 = arith.addf %382, %381 : vector<8x64xf32>
    %384 = arith.divf %382, %383 : vector<8x64xf32>
    %385 = vector.extract_strided_slice %376 {offsets = [0, 160], sizes = [8, 32], strides = [1, 1]} : vector<8x288xf32> to vector<8x32xf32>
    %386 = vector.extract_strided_slice %384 {offsets = [0, 0], sizes = [8, 32], strides = [1, 1]} : vector<8x64xf32> to vector<8x32xf32>
    %387 = vector.extract_strided_slice %376 {offsets = [0, 256], sizes = [8, 32], strides = [1, 1]} : vector<8x288xf32> to vector<8x32xf32>
    %388 = arith.mulf %386, %387 : vector<8x32xf32>
    %389 = arith.addf %385, %388 : vector<8x32xf32>
    %390 = math.tanh %389 : vector<8x32xf32>
    %391 = vector.extract_strided_slice %384 {offsets = [0, 32], sizes = [8, 32], strides = [1, 1]} : vector<8x64xf32> to vector<8x32xf32>
    %cst_69 = arith.constant 1.000000e+00 : f32
    %392 = vector.broadcast %cst_69 : f32 to vector<8x32xf32>
    %393 = arith.subf %392, %391 : vector<8x32xf32>
    %394 = arith.mulf %393, %390 : vector<8x32xf32>
    %395 = arith.mulf %391, %371 : vector<8x32xf32>
    %396 = arith.addf %394, %395 : vector<8x32xf32>
    %c56 = arith.constant 56 : index
    %c0_70 = arith.constant 0 : index
    %397 = vector.load %arg6[%c56, %c0_70] : memref<64x32xf32, #tpu.memory_space<vmem>>, vector<8x32xf32>
    tpu.vector_store %arg6[%c56, %c0_70], %396 {strides = array<i32>} : memref<64x32xf32, #tpu.memory_space<vmem>>, vector<8x32xf32>,
    %c0_71 = arith.constant 0 : index
    %c0_72 = arith.constant 0 : index
    %398 = vector.load %arg6[%c0_71, %c0_72] : memref<64x32xf32, #tpu.memory_space<vmem>>, vector<64x32xf32>
    %399 = math.tanh %398 : vector<64x32xf32>
    %400 = vector.broadcast %2 : vector<1x32xf32> to vector<64x32xf32>
    %401 = arith.mulf %399, %400 : vector<64x32xf32>
    %402 = tpu.transpose %401, [1, 0] : vector<64x32xf32> -> vector<32x64xf32>
    %cst_73 = arith.constant dense<0.000000e+00> : vector<64xf32>
    %403 = vector.multi_reduction <add>, %402, %cst_73 [0] : vector<32x64xf32> to vector<64xf32>
    %404 = vector.shape_cast %403 : vector<64xf32> to vector<1x64xf32>
    %405 = arith.addf %404, %5 : vector<1x64xf32>
    %cst_74 = arith.constant 0.000000e+00 : f32
    %406 = vector.broadcast %cst_74 : f32 to vector<1x64xf32>
    %407 = tpu.concatenate %405, %406 in 1 : vector<1x64xf32>, vector<1x64xf32> -> vector<1x128xf32>
    %c0_75 = arith.constant 0 : index
    %c0_76 = arith.constant 0 : index
    %408 = vector.load %arg4[%c0_75, %c0_76] : memref<1x128xf32, #tpu.memory_space<vmem>>, vector<1x128xf32>
    tpu.vector_store %arg4[%c0_75, %c0_76], %407 {strides = array<i32>} : memref<1x128xf32, #tpu.memory_space<vmem>>, vector<1x128xf32>,
    %c0_77 = arith.constant 0 : index
    %c0_78 = arith.constant 0 : index
    %c0_79 = arith.constant 0 : index
    %409 = vector.load %arg1[%c0_77, %c0_78, %c0_79] : memref<2x8x32xf32, #tpu.memory_space<vmem>>, vector<2x8x32xf32>
    %410 = math.tanh %409 : vector<2x8x32xf32>
    %c0_80 = arith.constant 0 : index
    %c0_81 = arith.constant 0 : index
    %c0_82 = arith.constant 0 : index
    %411 = vector.load %arg5[%c0_80, %c0_81, %c0_82] : memref<2x8x32xf32, #tpu.memory_space<vmem>>, vector<2x8x32xf32>
    tpu.vector_store %arg5[%c0_80, %c0_81, %c0_82], %410 {strides = array<i32>} : memref<2x8x32xf32, #tpu.memory_space<vmem>>, vector<2x8x32xf32>,
    return
  }
}

</mosaic_0001>

<bundles_post_ra>
// kernel: tpu_custom_call.1
= control target key start
LH: loop header
LB: loop body
LE: loop exit
PB: predicated region body
PF: predicated region fallthrough
CT: control target
= control target key end

     0   :  { %11 = vsyncpa [#allocation4], 0  ;;  %s2696_s0 = inlined_call_operand.hbm [shape: f32[8,8,16], index: 0, kind: input, shape index: {}]   ;;  %s2697_s1 = inlined_call_operand.hbm [shape: f32[2,8,32], index: 1, kind: input, shape index: {}]   ;;  %s2698_s2 = inlined_call_operand.hbm [shape: f32[20,288], index: 2, kind: input, shape index: {}]   ;;  %s2699_s3 = inlined_call_operand.hbm [shape: bf16[96,288], index: 3, kind: input, shape index: {}]   ;;  %s2700_s4 = inlined_call_operand.hbm [shape: f32[1,128], index: 4, kind: output, shape index: {0}]   ;;  %s2701_s5 = inlined_call_operand.hbm [shape: f32[2,8,32], index: 5, kind: output, shape index: {1}]  }
   0x1   :  { %12 = vsyncpa [#allocation7], 0 }
   0x2   :  { %13 = vsyncpa [#allocation10], 0 }
   0x3   :  { %14 = vsyncpa [#allocation5], 0 }
   0x4   :  { %15 = vsyncpa [#allocation13], 0  ;;  %s33_s20 = sshll.u32 %s2697_s1, 4  ;;  %s2172_s21 = smov [#allocation6]   ;;  %s34_s20 = int_to_ptr.hbm [resolvable:$true] %s33_s20 }
   0x5   :  { %s35_s22 = sshll.u32 %s2172_s21, 4  ;;  %s20_s25 = sshll.u32 %s2696_s0, 4  ;;  %s36_s22 = int_to_ptr.vmem [resolvable:$true] %s35_s22  ;;  %s21_s25 = int_to_ptr.hbm [resolvable:$true] %s20_s25 }
   0x6   :  { %s2173_s26 = smov 128   ;;  %s2174_s27 = smov 8  }
   0x7   :  { %41 = dma.hbm_to_vmem [thread:$0]  %s34_s20, 256, %s36_s22, [#allocation7], %s2173_s26, %s2173_s26, %s2174_s27  }
   0x8   :  { %s2175_s28 = smov [#allocation3]   ;;  %s46_s1 = sshll.u32 %s2698_s2, 4  ;;  %s47_s1 = int_to_ptr.hbm [resolvable:$true] %s46_s1 }
   0x9   :  { %s22_s29 = sshll.u32 %s2175_s28, 4  ;;  %s2176_s0 = smov [#allocation8]   ;;  %s23_s29 = int_to_ptr.vmem [resolvable:$true] %s22_s29 }
   0xa   :  { %28 = dma.hbm_to_vmem [thread:$0]  %s21_s25, 1024, %s23_s29, [#allocation4], %s2173_s26, %s2173_s26, %s2174_s27  }
   0xb   :  { %s48_s7 = sshll.u32 %s2176_s0, 4  ;;  %s59_s10 = sshll.u32 %s2699_s3, 4  ;;  %s49_s7 = int_to_ptr.vmem [resolvable:$true] %s48_s7  ;;  %s60_s10 = int_to_ptr.hbm [resolvable:$true] %s59_s10 }
   0xc   :  { %s2177_s11 = smov 384   ;;  %s2178_s12 = smov 24  }
   0xd   :  { %54 = dma.hbm_to_vmem [thread:$0]  %s47_s1, 1152, %s49_s7, [#allocation7], %s2177_s11, %s2177_s11, %s2178_s12  }
   0xe   :  { %s2179_s13 = smov [#allocation9]   ;;  %s2180_s2 = smov 192  }
   0xf   :  { %s61_s14 = sshll.u32 %s2179_s13, 4  ;;  %s2181_s15 = smov 12   ;;  %s62_s14 = int_to_ptr.vmem [resolvable:$true] %s61_s14 }
  0x10   :  { %67 = dma.hbm_to_vmem [thread:$0]  %s60_s10, 2304, %s62_s14, [#allocation10], %s2180_s2, %s2180_s2, %s2181_s15  }
  0x11   :  { %2162 = dma.done.wait [#allocation4], 1024  }
  0x12   :  { %2163 = vsyncadd [#allocation4], 4294966272 }
  0x13   :  { %2164 = dma.done.wait [#allocation7], 1408  }
  0x14   :  { %2165 = vsyncadd [#allocation7], 4294965888 }
  0x15   :  { %2166 = dma.done.wait [#allocation10], 2304  }
  0x16   :  { %2167 = vsyncadd [#allocation10], 4294964992  ;;  %v2235_v0 = vld [vmem:[#allocation6 + $0x8] sm:$0xff]  ;;  %v85_v2 = vld [vmem:[#allocation8] sm:$0xff]  ;;  %s2182_s3 = smov 32   ;;  %vm121_vm0 = vcmask 130048  }
  0x17   :  { %v86_v1 = vld [vmem:[#allocation8 + $0x18] sm:$0xff]  ;;  %272 = vrot.lane.b32.xlu0 %v2235_v0, %s2182_s3  ;;  %v113_v3 = vld [vmem:[#allocation3] sm:$0xff]  ;;  %v1755_v4 = vld [vmem:[#allocation9 + $0x78] sm:$0xf]  ;;  %vm219_vm1 = vcmask 261120   ;;  %vm301_vm2 = vcmask 523264  }
  0x18   :  { %160 = vmatpush.msra.mxu0 %v86_v1  ;;  %v1850_v5 = vld [vmem:[#allocation9 + $0x80] sm:$0xf0]  ;;  %v1751_v6 = vld [vmem:[#allocation9 + $0x60] sm:$0xf]  ;;  %v1847_v7 = vld [vmem:[#allocation9 + $0x68] sm:$0xf0] }
  0x19   :  { %v2239_v8 = vor.u32 %v1850_v5, %v1755_v4  ;;  %v2243_v9 = vor.u32 %v1847_v7, %v1751_v6  ;;  %v1747_v10 = vld [vmem:[#allocation9 + $0x48] sm:$0xf]  ;;  %v1844_v11 = vld [vmem:[#allocation9 + $0x50] sm:$0xf0]  ;;  %v1743_v14 = vld [vmem:[#allocation9 + $0x30] sm:$0xf] }
  0x1a   :  { %161 = vmatpush.msra.mxu0 %v85_v2  ;;  %v114_v12 = vld [vmem:[#allocation3 + $0x8] sm:$0xff]  ;;  %v2247_v13 = vor.u32 %v1844_v11, %v1747_v10  ;;  %v1841_v15 = vld [vmem:[#allocation9 + $0x38] sm:$0xf0]  ;;  %v268_v17 = vld [vmem:[#allocation6] sm:$0xff]  ;;  %s2183_s16 = smov 64   ;;  %s2184_s17 = smov 96  }
  0x1b   :  { %1721 = vmatmul.msk.f32.vlgmr.msra.gmra.mxu0 %vm121_vm0, %v113_v3  ;;  %309 = vmatpush.bf16.msra.mxu2 %v2239_v8  ;;  %v2253_v16 = vor.u32 %v1841_v15, %v1743_v14  ;;  %v1735_v18 = vld [vmem:[#allocation9 + $0x18] sm:$0xf]  ;;  %v1839_v19 = vld [vmem:[#allocation9 + $0x20] sm:$0xf0]  ;;  %v1731_v21 = vld [vmem:[#allocation9] sm:$0xf] }
  0x1c   :  { %414 = vmatpush.bf16.msra.mxu3 %v2239_v8  ;;  %356 = vrot.lane.b32.xlu2 %v268_v17, %s2182_s3  ;;  %v1736_v20 = vor.u32 %v1839_v19, %v1735_v18  ;;  %v1838_v22 = vld [vmem:[#allocation9 + $0x8] sm:$0xf0]  ;;  %v2263_v27 = vld [vmem:[#allocation8 + $0x30] ss:$0 sm:$0xff]  ;;  %v2275_v42 = vld [vmem:[#allocation8 + $0x33] ss:$0 sm:$0xff] }
  0x1d   :  { %v1732_v23 = vor.u32 %v1838_v22, %v1731_v21  ;;  %v2268_v37 = vld [vmem:[#allocation8 + $0x32] ss:$8 sm:$0x7]  ;;  %v1849_v1 = vld [vmem:[#allocation9 + $0x7c] sm:$0xf]  ;;  %s2185_s18 = smov [#allocation12]  }
  0x1e   :  { %238 = vmatpush.bf16.msra.mxu1 %v1736_v20  ;;  %v2271_v38 = vperm.slane %v2268_v37, 0  ;;  %v1783_v2 = vld [vmem:[#allocation9 + $0x84] sm:$0xf0]  ;;  %v1846_v3 = vld [vmem:[#allocation9 + $0x64] sm:$0xf]  ;;  %s1699_s19 = sshll.u32 %s2185_s18, 4  ;;  %s1700_s19 = int_to_ptr.vmem [resolvable:$true] %s1699_s19 }
  0x1f   :  { %310 = vmatpush.bf16.msra.mxu2 %v2243_v9  ;;  %v2280_v4 = vor.u32 %v1849_v1, %v1783_v2  ;;  %v1775_v5 = vld [vmem:[#allocation9 + $0x6c] sm:$0xf0]  ;;  %v1843_v7 = vld [vmem:[#allocation9 + $0x4c] sm:$0xf]  ;;  %v1767_v10 = vld [vmem:[#allocation9 + $0x54] sm:$0xf0] }
  0x20   :  { %415 = vmatpush.bf16.msra.mxu3 %v2243_v9  ;;  %v2283_v6 = vor.u32 %v1846_v3, %v1775_v5  ;;  %v2287_v11 = vor.u32 %v1843_v7, %v1767_v10  ;;  %v1759_v14 = vld [vmem:[#allocation9 + $0x3c] sm:$0xf0]  ;;  %s1701_s22 = sshll.u32 %s2701_s5, 4  ;;  %s2186_s5 = smov [#allocation11]   ;;  %s1702_s22 = int_to_ptr.hbm [resolvable:$true] %s1701_s22 }
  0x21   :  { %737 = vmatpush.bf16.msrb.mxu0 %v2280_v4  ;;  %s1689_s23 = sshll.u32 %s2186_s5, 4  ;;  %s1690_s23 = int_to_ptr.vmem [resolvable:$true] %s1689_s23 }
  0x22   :  { %239 = vmatpush.bf16.msra.mxu1 %v1732_v23  ;;  %v1789_v23 = vld [vmem:[#allocation9 + $0x80] sm:$0xf] }
  0x23   :  { %1722 = vmatmul.msk.f32.gmra.mxu0 %vm121_vm0, %v114_v12  ;;  %311 = vmatpush.bf16.msra.mxu2 %v2247_v13  ;;  %v1840_v12 = vld [vmem:[#allocation9 + $0x34] sm:$0xf] }
  0x24   :  { %416 = vmatpush.bf16.msra.mxu3 %v2247_v13  ;;  %v2291_v15 = vor.u32 %v1840_v12, %v1759_v14 }
  0x25   :  { %738 = vmatpush.bf16.msrb.mxu0 %v2283_v6 }
  0x27   :  { %312 = vmatpush.bf16.msra.mxu2 %v2253_v16 }
  0x28   :  { %417 = vmatpush.bf16.msra.mxu3 %v2253_v16 }
  0x29   :  { %739 = vmatpush.bf16.msrb.mxu0 %v2287_v11 }
  0x2b   :  { %427 = vmatpush.bf16.msrb.mxu2 %v2280_v4 }
  0x2d   :  { %740 = vmatpush.bf16.msrb.mxu0 %v2291_v15 }
  0x2f   :  { %428 = vmatpush.bf16.msrb.mxu2 %v2283_v6 }
  0x33   :  { %429 = vmatpush.bf16.msrb.mxu2 %v2287_v11 }
  0x37   :  { %430 = vmatpush.bf16.msrb.mxu2 %v2291_v15 }
  0x89   :  { %v2258_v24 = vpop.permute.xlu0 %272 }
  0x8a   :  { %v275_v25 = vsel %vm219_vm1, %v268_v17, %v2258_v24  ;;  %v357_v17 = vpop.permute.xlu2 %356 }
  0x8b   :  { %v276_v26 = vpack.c.bf16 %v275_v25, %v275_v25  ;;  %v1851_v25 = vld [vmem:[#allocation9 + $0x88] sm:$0xf0] }
  0x8d   :  { %1757 = vmatmul.msk.bf16.vlgmr.msra.gmra.mxu2 %vm301_vm2, %v276_v26  ;;  %v2304_v26 = vor.u32 %v1851_v25, %v1789_v23 }
  0x8e   :  { %569 = vmatpush.bf16.msra.mxu2 %v2239_v8 }
  0x8f   :  { %440 = vmatpush.bf16.msrb.mxu3 %v2304_v26  ;;  %750 = vmatpush.bf16.msrb.mxu1 %v2304_v26 }
  0x90   :  { %905 = vmatpush.bf16.msra.mxu0 %v2304_v26 }
  0x92   :  { %570 = vmatpush.bf16.msra.mxu2 %v2243_v9 }
  0x96   :  { %571 = vmatpush.bf16.msra.mxu2 %v2247_v13 }
  0x98   :  { %v163_v28 = vpop.f32.mrf.mxu0 }
  0x99   :  { %v164_v29 = vadd.f32 %v163_v28, %v2263_v27  ;;  %v1781_v28 = vld [vmem:[#allocation9 + $0x68] sm:$0xf] }
  0x9a   :  { %572 = vmatpush.bf16.msra.mxu2 %v2253_v16 }
  0x9b   :  { %v187_v30 = vmul.f32 0.01, %v164_v29 }
  0x9d   :  { %v195_v33 = vmax.f32 %v164_v29, %v187_v30  ;;  %v1848_v29 = vld [vmem:[#allocation9 + $0x70] sm:$0xf0] }
  0x9e   :  { %v2307_v30 = vor.u32 %v1848_v29, %v1781_v28 }
  0xa0   :  { %v166_v31 = vpop.f32.mrf.mxu0  ;;  %441 = vmatpush.bf16.msrb.mxu3 %v2307_v30  ;;  %751 = vmatpush.bf16.msrb.mxu1 %v2307_v30 }
  0xa1   :  { %v167_v32 = vadd.f32 %v166_v31, %v2263_v27  ;;  %v1773_v31 = vld [vmem:[#allocation9 + $0x50] sm:$0xf]  ;;  %906 = vmatpush.bf16.msra.mxu0 %v2307_v30 }
  0xa3   :  { %v188_v34 = vmul.f32 0.01, %v167_v32 }
  0xa5   :  { %v196_v35 = vmax.f32 %v167_v32, %v188_v34  ;;  %v1845_v32 = vld [vmem:[#allocation9 + $0x58] sm:$0xf0]  ;;  %v1765_v34 = vld [vmem:[#allocation9 + $0x38] sm:$0xf] }
  0xa7   :  { %v203_v36 = vpack.c.bf16 %v196_v35, %v195_v33  ;;  %v2312_v33 = vor.u32 %v1845_v32, %v1773_v31  ;;  %v1842_v35 = vld [vmem:[#allocation9 + $0x40] sm:$0xf0] }
  0xa9   :  { %1737 = vmatmul.msk.bf16.vlgmr.msra.gmra.mxu1 %vm219_vm1, %v203_v36  ;;  %442 = vmatpush.bf16.msrb.mxu3 %v2312_v33  ;;  %v2317_v36 = vor.u32 %v1842_v35, %v1765_v34 }
  0xaa   :  { %752 = vmatpush.bf16.msrb.mxu1 %v2312_v33  ;;  %907 = vmatpush.bf16.msra.mxu0 %v2312_v33 }
  0xad   :  { %443 = vmatpush.bf16.msrb.mxu3 %v2317_v36 }
  0xae   :  { %753 = vmatpush.bf16.msrb.mxu1 %v2317_v36  ;;  %908 = vmatpush.bf16.msra.mxu0 %v2317_v36 }
  0xb2   :  { %1034 = vmatpush.bf16.msra.mxu1 %v2239_v8 }
  0xb6   :  { %1035 = vmatpush.bf16.msra.mxu1 %v2243_v9 }
  0xba   :  { %1036 = vmatpush.bf16.msra.mxu1 %v2247_v13 }
  0xbe   :  { %1037 = vmatpush.bf16.msra.mxu1 %v2253_v16 }
 0x110   :  { %v314_v39 = vpop.f32.mrf.mxu2 }
 0x111   :  { %v315_v40 = vadd.f32 %v314_v39, %v2271_v38 }
 0x113   :  { %339 = vrot.lane.b32.xlu0 %v315_v40, %s2183_s16 }
 0x118   :  { %v316_v41 = vpop.f32.mrf.mxu2 }
 0x126   :  { %v241_v43 = vpop.f32.mrf.mxu1 }
 0x127   :  { %v242_v44 = vadd.f32 %v241_v43, %v2275_v42 }
 0x129   :  { %v318_v45 = vadd.f32 %v315_v40, %v242_v44 }
 0x12b   :  { %v1758_v46 = vmul.f32 -1.442695, %v318_v45 }
 0x12d   :  { %1868 = vpow2.f32 %v1758_v46 }
 0x133   :  { %v1869_v47 = vpop.eup %1868 }
 0x134   :  { %v322_v48 = vadd.f32 1.0, %v1869_v47 }
 0x136   :  { %1870 = vrcp.f32 %v322_v48  ;;  %v334_v54 = vand.u32 2147483648, %v322_v48  ;;  %vm328_vm4 = vweird.f32 %v322_v48  ;;  %v332_v55 = vand.u32 2147483647, %v322_v48 }
 0x138   :  { %v335_v57 = vor.u32 1.1754944e-38, %v334_v54  ;;  %vm333_vm6 = vcmp.eq.f32.partialorder %v332_v55, 8.507059e+37 }
 0x13c   :  { %v1871_v49 = vpop.eup %1870 }
 0x13d   :  { %v324_v50 = vmul.f32 %v1871_v49, %v322_v48  ;;  %vm329_vm3 = vweird.f32 %v1871_v49 }
 0x13e   :  { %vm330_vm5 = vmor %vm328_vm4, %vm329_vm3 }
 0x13f   :  { %v325_v51 = vsub.f32 1.0, %v324_v50 }
 0x141   :  { %v326_v52 = vmul.f32 %v1871_v49, %v325_v51 }
 0x143   :  { %v327_v53 = vadd.f32 %v1871_v49, %v326_v52 }
 0x145   :  { %v331_v56 = vsel %vm330_vm5, %v1871_v49, %v327_v53  ;;  %v2356_v49 = vperm.slane %v2268_v37, 2  ;;  %v243_v53 = vpop.f32.mrf.mxu1 }
 0x146   :  { %v336_v58 = vsel %vm333_vm6, %v335_v57, %v331_v56  ;;  %v244_v54 = vadd.f32 %v243_v53, %v2275_v42 }
 0x147   :  { %v349_v18 = vsub.f32 1.0, %v336_v58  ;;  %v359_v20 = vmul.f32 %v357_v17, %v336_v58 }
 0x185   :  { %v340_v59 = vpop.permute.xlu0 %339 }
 0x186   :  { %v342_v60 = vmul.f32 %v340_v59, %v336_v58 }
 0x188   :  { %344 = vrot.lane.b32.xlu1 %v342_v60, %s2183_s16 }
 0x1fa   :  { %v345_v61 = vpop.permute.xlu1 %344 }
 0x1fb   :  { %v347_v62 = vadd.f32 %v345_v61, %v242_v44 }
 0x1fd   :  { %1872 = vtanh.f32 %v347_v62 }
 0x203   :  { %v1873_v63 = vpop.eup %1872 }
 0x204   :  { %351 = vrot.lane.b32.xlu1 %v1873_v63, %s2184_s17 }
 0x276   :  { %v352_v19 = vpop.permute.xlu1 %351 }
 0x277   :  { %v354_v21 = vmul.f32 %v352_v19, %v349_v18 }
 0x279   :  { %v2300_v22 = vadd.f32 %v359_v20, %v354_v21 }
 0x27b   :  { %362 = vrot.lane.b32.xlu2 %v2300_v22, %s2184_s17 }
 0x2d5   :  { %v363_v39 = vpop.permute.xlu2 %362 }
 0x2d6   :  { %v365_v40 = vsel %vm219_vm1, %v363_v39, %v2258_v24  ;;  %v2346_v24 = vperm.slane %v2268_v37, 1 }
 0x2d7   :  { %v366_v41 = vpack.c.bf16 %v365_v40, %v365_v40 }
 0x2d9   :  { %1791 = vmatmul.msk.bf16.vlgmr.msra.gmra.mxu3 %vm301_vm2, %v366_v41  ;;  %1792 = vmatmul.msk.bf16.vlgmr.msrb.gmra.mxu2 %vm301_vm2, %v366_v41 }
 0x2da   :  { %582 = vmatpush.bf16.msra.mxu3 %v2280_v4  ;;  %595 = vmatpush.bf16.msrb.mxu2 %v2304_v26 }
 0x2de   :  { %583 = vmatpush.bf16.msra.mxu3 %v2283_v6  ;;  %596 = vmatpush.bf16.msrb.mxu2 %v2307_v30 }
 0x2e2   :  { %584 = vmatpush.bf16.msra.mxu3 %v2287_v11  ;;  %597 = vmatpush.bf16.msrb.mxu2 %v2312_v33 }
 0x2e6   :  { %585 = vmatpush.bf16.msra.mxu3 %v2291_v15  ;;  %598 = vmatpush.bf16.msrb.mxu2 %v2317_v36 }
 0x2e9   :  { %1793 = vmatmul.msk.bf16.vlgmr.msrb.gmra.mxu3 %vm301_vm2, %v366_v41 }
 0x2ea   :  { %724 = vmatpush.bf16.msrb.mxu3 %v2239_v8 }
 0x2ee   :  { %725 = vmatpush.bf16.msrb.mxu3 %v2243_v9 }
 0x2f2   :  { %726 = vmatpush.bf16.msrb.mxu3 %v2247_v13 }
 0x2f6   :  { %727 = vmatpush.bf16.msrb.mxu3 %v2253_v16 }
 0x35c   :  { %v419_v43 = vpop.f32.mrf.mxu3  ;;  %v432_v44 = vpop.f32.mrf.mxu2 }
 0x35d   :  { %v420_v45 = vadd.f32 %v419_v43, %v2271_v38  ;;  %v2350_v46 = vadd.f32 %v432_v44, %v2346_v24 }
 0x35f   :  { %489 = vrot.lane.b32.xlu0 %v2350_v46, %s2182_s3  ;;  %470 = vrot.lane.b32.xlu1 %v420_v45, %s2183_s16  ;;  %v449_v55 = vadd.f32 %v420_v45, %v244_v54 }
 0x361   :  { %v1794_v56 = vmul.f32 -1.442695, %v449_v55 }
 0x363   :  { %1874 = vpow2.f32 %v1794_v56 }
 0x364   :  { %v421_v47 = vpop.f32.mrf.mxu3  ;;  %v434_v48 = vpop.f32.mrf.mxu2 }
 0x369   :  { %v1875_v57 = vpop.eup %1874 }
 0x36a   :  { %v453_v58 = vadd.f32 1.0, %v1875_v57 }
 0x36c   :  { %v445_v50 = vpop.f32.mrf.mxu3  ;;  %1876 = vrcp.f32 %v453_v58  ;;  %v465_v63 = vand.u32 2147483648, %v453_v58  ;;  %vm459_vm8 = vweird.f32 %v453_v58  ;;  %v463_v1 = vand.u32 2147483647, %v453_v58 }
 0x36d   :  { %v446_v51 = vadd.f32 %v445_v50, %v2356_v49  ;;  %v115_v50 = vld [vmem:[#allocation3 + $0x10] sm:$0xff] }
 0x36e   :  { %v466_v3 = vor.u32 1.1754944e-38, %v465_v63  ;;  %vm464_vm10 = vcmp.eq.f32.partialorder %v463_v1, 8.507059e+37  ;;  %1723 = vmatmul.msk.f32.gmra.mxu0 %vm121_vm0, %v115_v50 }
 0x36f   :  { %533 = vrot.lane.b32.xlu2 %v446_v51, %s2184_s17  ;;  %v116_v51 = vld [vmem:[#allocation3 + $0x18] sm:$0xff] }
 0x372   :  { %v1877_v59 = vpop.eup %1876 }
 0x373   :  { %v455_v60 = vmul.f32 %v1877_v59, %v453_v58  ;;  %vm460_vm7 = vweird.f32 %v1877_v59 }
 0x374   :  { %v447_v52 = vpop.f32.mrf.mxu3  ;;  %vm461_vm9 = vmor %vm459_vm8, %vm460_vm7 }
 0x375   :  { %v456_v61 = vsub.f32 1.0, %v455_v60 }
 0x376   :  { %1724 = vmatmul.msk.f32.gmra.mxu0 %vm121_vm0, %v116_v51 }
 0x377   :  { %v457_v37 = vmul.f32 %v1877_v59, %v456_v61 }
 0x379   :  { %v458_v62 = vadd.f32 %v1877_v59, %v457_v37 }
 0x37b   :  { %v462_v2 = vsel %vm461_vm9, %v1877_v59, %v458_v62 }
 0x37c   :  { %v467_v10 = vsel %vm464_vm10, %v466_v3, %v462_v2 }
 0x37d   :  { %v480_v52 = vsub.f32 1.0, %v467_v10  ;;  %v486_v55 = vmul.f32 %v467_v10, %v2300_v22 }
 0x3c9   :  { %v534_v35 = vpop.permute.xlu2 %533 }
 0x3d1   :  { %v490_v5 = vpop.permute.xlu0 %489  ;;  %v471_v7 = vpop.permute.xlu1 %470 }
 0x3d2   :  { %v492_v12 = vadd.f32 %v490_v5, %v420_v45  ;;  %v473_v14 = vmul.f32 %v471_v7, %v467_v10 }
 0x3d4   :  { %v1795_v17 = vmul.f32 -1.442695, %v492_v12  ;;  %475 = vrot.lane.b32.xlu0 %v473_v14, %s2183_s16 }
 0x3d6   :  { %1878 = vpow2.f32 %v1795_v17 }
 0x3dc   :  { %v1879_v18 = vpop.eup %1878 }
 0x3dd   :  { %v500_v19 = vadd.f32 1.0, %v1879_v18 }
 0x3df   :  { %1880 = vrcp.f32 %v500_v19  ;;  %v513_v25 = vand.u32 2147483648, %v500_v19  ;;  %v511_v29 = vand.u32 2147483647, %v500_v19  ;;  %vm507_vm12 = vweird.f32 %v500_v19 }
 0x3e1   :  { %v514_v32 = vor.u32 1.1754944e-38, %v513_v25  ;;  %vm512_vm14 = vcmp.eq.f32.partialorder %v511_v29, 8.507059e+37 }
 0x3e5   :  { %v1881_v20 = vpop.eup %1880 }
 0x3e6   :  { %v503_v21 = vmul.f32 %v1881_v20, %v500_v19  ;;  %vm508_vm11 = vweird.f32 %v1881_v20 }
 0x3e7   :  { %vm509_vm13 = vmor %vm507_vm12, %vm508_vm11 }
 0x3e8   :  { %v504_v23 = vsub.f32 1.0, %v503_v21 }
 0x3ea   :  { %v505_v28 = vmul.f32 %v1881_v20, %v504_v23 }
 0x3eb   :  { %v169_v18 = vpop.f32.mrf.mxu0 }
 0x3ec   :  { %v506_v31 = vadd.f32 %v1881_v20, %v505_v28  ;;  %v170_v19 = vadd.f32 %v169_v18, %v2263_v27 }
 0x3ee   :  { %v510_v34 = vsel %vm509_vm13, %v1881_v20, %v506_v31  ;;  %v189_v20 = vmul.f32 0.01, %v170_v19 }
 0x3ef   :  { %v515_v39 = vsel %vm512_vm14, %v514_v32, %v510_v34 }
 0x3f0   :  { %v536_v40 = vmul.f32 %v534_v35, %v515_v39  ;;  %v197_v25 = vmax.f32 %v170_v19, %v189_v20 }
 0x3f2   :  { %538 = vrot.lane.b32.xlu1 %v536_v40, %s2183_s16 }
 0x3f3   :  { %v172_v21 = vpop.f32.mrf.mxu0 }
 0x3f4   :  { %v173_v23 = vadd.f32 %v172_v21, %v2263_v27 }
 0x3f6   :  { %v190_v28 = vmul.f32 0.01, %v173_v23 }
 0x3f8   :  { %v198_v29 = vmax.f32 %v173_v23, %v190_v28 }
 0x446   :  { %v476_v41 = vpop.permute.xlu0 %475 }
 0x447   :  { %v478_v43 = vadd.f32 %v476_v41, %v244_v54  ;;  %v493_v54 = vadd.f32 %v490_v5, %v2350_v46 }
 0x449   :  { %1882 = vtanh.f32 %v478_v43  ;;  %v1796_v58 = vmul.f32 -1.442695, %v493_v54 }
 0x44f   :  { %v1883_v44 = vpop.eup %1882 }
 0x450   :  { %482 = vrot.lane.b32.xlu2 %v1883_v44, %s2184_s17 }
 0x464   :  { %v539_v45 = vpop.permute.xlu1 %538 }
 0x465   :  { %v541_v47 = vadd.f32 %v539_v45, %v2350_v46 }
 0x467   :  { %1884 = vtanh.f32 %v541_v47 }
 0x468   :  { %1886 = vpow2.f32 %v1796_v58 }
 0x46d   :  { %v1885_v48 = vpop.eup %1884 }
 0x46e   :  { %545 = vrot.lane.b32.xlu0 %v1885_v48, %s2184_s17  ;;  %v1887_v59 = vpop.eup %1886 }
 0x46f   :  { %v501_v60 = vadd.f32 1.0, %v1887_v59 }
 0x471   :  { %1888 = vrcp.f32 %v501_v60  ;;  %v528_v46 = vand.u32 2147483648, %v501_v60  ;;  %vm522_vm3 = vweird.f32 %v501_v60  ;;  %v526_v22 = vand.u32 2147483647, %v501_v60 }
 0x473   :  { %v529_v3 = vor.u32 1.1754944e-38, %v528_v46  ;;  %vm527_vm5 = vcmp.eq.f32.partialorder %v526_v22, 8.507059e+37 }
 0x477   :  { %v1889_v61 = vpop.eup %1888 }
 0x478   :  { %v518_v37 = vmul.f32 %v1889_v61, %v501_v60  ;;  %vm523_vm15 = vweird.f32 %v1889_v61 }
 0x479   :  { %vm524_vm4 = vmor %vm522_vm3, %vm523_vm15 }
 0x47a   :  { %v519_v62 = vsub.f32 1.0, %v518_v37 }
 0x47c   :  { %v520_v63 = vmul.f32 %v1889_v61, %v519_v62 }
 0x47e   :  { %v521_v1 = vadd.f32 %v1889_v61, %v520_v63 }
 0x480   :  { %v525_v2 = vsel %vm524_vm4, %v1889_v61, %v521_v1 }
 0x481   :  { %v530_v5 = vsel %vm527_vm5, %v529_v3, %v525_v2 }
 0x482   :  { %v543_v7 = vsub.f32 1.0, %v530_v5  ;;  %v549_v12 = vmul.f32 %v530_v5, %v2235_v0  ;;  %v204_v0 = vpack.c.bf16 %v198_v29, %v197_v25 }
 0x484   :  { %1738 = vmatmul.msk.bf16.gmra.mxu1 %vm219_vm1, %v204_v0 }
 0x4aa   :  { %v483_v53 = vpop.permute.xlu2 %482 }
 0x4ab   :  { %v485_v56 = vmul.f32 %v483_v53, %v480_v52 }
 0x4ad   :  { %v2370_v57 = vadd.f32 %v486_v55, %v485_v56 }
 0x4af   :  { %553 = vrot.lane.b32.xlu1 %v2370_v57, %s2184_s17 }
 0x4e0   :  { %v546_v10 = vpop.permute.xlu0 %545 }
 0x4e1   :  { %v548_v14 = vmul.f32 %v546_v10, %v543_v7 }
 0x4e3   :  { %v2375_v17 = vadd.f32 %v549_v12, %v548_v14 }
 0x4e5   :  { %551 = vst.msk [vmem:[#allocation2] sm:$0xff] %vm219_vm1, %v2375_v17  ;;  %557 = vrot.lane.b32.xlu2 %v2375_v17, %s2182_s3 }
 0x501   :  { %v246_v51 = vpop.f32.mrf.mxu1 }
 0x502   :  { %v247_v52 = vadd.f32 %v246_v51, %v2275_v42  ;;  %v120_v51 = vld [vmem:[#allocation3 + $0x38] sm:$0xff] }
 0x521   :  { %v554_v31 = vpop.permute.xlu1 %553 }
 0x53f   :  { %v558_v32 = vpop.permute.xlu2 %557 }
 0x540   :  { %v560_v34 = vsel %vm219_vm1, %v554_v31, %v558_v32 }
 0x541   :  { %v561_v35 = vpack.c.bf16 %v560_v34, %v560_v34 }
 0x543   :  { %1797 = vmatmul.msk.bf16.vlgmr.msra.gmra.mxu2 %vm301_vm2, %v561_v35  ;;  %1798 = vmatmul.msk.bf16.vlgmr.msra.gmra.mxu3 %vm301_vm2, %v561_v35 }
 0x544   :  { %892 = vmatpush.bf16.msra.mxu3 %v2280_v4  ;;  %879 = vmatpush.bf16.msra.mxu2 %v2239_v8 }
 0x548   :  { %893 = vmatpush.bf16.msra.mxu3 %v2283_v6  ;;  %880 = vmatpush.bf16.msra.mxu2 %v2243_v9 }
 0x54c   :  { %894 = vmatpush.bf16.msra.mxu3 %v2287_v11  ;;  %881 = vmatpush.bf16.msra.mxu2 %v2247_v13 }
 0x550   :  { %895 = vmatpush.bf16.msra.mxu3 %v2291_v15  ;;  %882 = vmatpush.bf16.msra.mxu2 %v2253_v16 }
 0x553   :  { %1799 = vmatmul.msk.bf16.vlgmr.msrb.gmra.mxu2 %vm301_vm2, %v561_v35 }
 0x554   :  { %1047 = vmatpush.bf16.msrb.mxu2 %v2280_v4 }
 0x558   :  { %1048 = vmatpush.bf16.msrb.mxu2 %v2283_v6 }
 0x55c   :  { %1049 = vmatpush.bf16.msrb.mxu2 %v2287_v11 }
 0x560   :  { %1050 = vmatpush.bf16.msrb.mxu2 %v2291_v15 }
 0x5c6   :  { %v574_v39 = vpop.f32.mrf.mxu2  ;;  %v587_v40 = vpop.f32.mrf.mxu3 }
 0x5c7   :  { %v575_v41 = vadd.f32 %v574_v39, %v2271_v38  ;;  %v2402_v43 = vadd.f32 %v587_v40, %v2346_v24  ;;  %v117_v40 = vld [vmem:[#allocation3 + $0x20] sm:$0xff] }
 0x5c8   :  { %1725 = vmatmul.msk.f32.gmra.mxu0 %vm121_vm0, %v117_v40 }
 0x5c9   :  { %644 = vrot.lane.b32.xlu0 %v2402_v43, %s2182_s3  ;;  %625 = vrot.lane.b32.xlu1 %v575_v41, %s2183_s16  ;;  %v604_v53 = vadd.f32 %v575_v41, %v247_v52 }
 0x5cb   :  { %v1800_v54 = vmul.f32 -1.442695, %v604_v53 }
 0x5cd   :  { %1890 = vpow2.f32 %v1800_v54 }
 0x5ce   :  { %v576_v44 = vpop.f32.mrf.mxu2  ;;  %v589_v45 = vpop.f32.mrf.mxu3 }
 0x5cf   :  { %v118_v44 = vld [vmem:[#allocation3 + $0x28] sm:$0xff]  ;;  %v119_v45 = vld [vmem:[#allocation3 + $0x30] sm:$0xff] }
 0x5d0   :  { %1726 = vmatmul.msk.f32.gmra.mxu0 %vm121_vm0, %v118_v44 }
 0x5d3   :  { %v1891_v55 = vpop.eup %1890 }
 0x5d4   :  { %v608_v56 = vadd.f32 1.0, %v1891_v55 }
 0x5d6   :  { %v600_v47 = vpop.f32.mrf.mxu2  ;;  %1892 = vrcp.f32 %v608_v56  ;;  %v620_v62 = vand.u32 2147483648, %v608_v56  ;;  %vm614_vm7 = vweird.f32 %v608_v56  ;;  %v618_v63 = vand.u32 2147483647, %v608_v56 }
 0x5d7   :  { %v601_v48 = vadd.f32 %v600_v47, %v2356_v49 }
 0x5d8   :  { %v621_v46 = vor.u32 1.1754944e-38, %v620_v62  ;;  %vm619_vm9 = vcmp.eq.f32.partialorder %v618_v63, 8.507059e+37  ;;  %1727 = vmatmul.msk.f32.gmra.mxu0 %vm121_vm0, %v119_v45 }
 0x5d9   :  { %688 = vrot.lane.b32.xlu2 %v601_v48, %s2184_s17 }
 0x5dc   :  { %v1893_v58 = vpop.eup %1892 }
 0x5dd   :  { %v610_v59 = vmul.f32 %v1893_v58, %v608_v56  ;;  %vm615_vm6 = vweird.f32 %v1893_v58 }
 0x5de   :  { %v602_v50 = vpop.f32.mrf.mxu2  ;;  %vm616_vm8 = vmor %vm614_vm7, %vm615_vm6 }
 0x5df   :  { %v611_v60 = vsub.f32 1.0, %v610_v59 }
 0x5e0   :  { %1728 = vmatmul.msk.f32.gmra.mxu0 %vm121_vm0, %v120_v51 }
 0x5e1   :  { %v612_v61 = vmul.f32 %v1893_v58, %v611_v60 }
 0x5e3   :  { %v613_v37 = vadd.f32 %v1893_v58, %v612_v61 }
 0x5e5   :  { %v617_v1 = vsel %vm616_vm8, %v1893_v58, %v613_v37 }
 0x5e6   :  { %v622_v3 = vsel %vm619_vm9, %v621_v46, %v617_v1 }
 0x5e7   :  { %v641_v55 = vmul.f32 %v622_v3, %v2370_v57 }
 0x633   :  { %v689_v31 = vpop.permute.xlu2 %688 }
 0x63b   :  { %v645_v22 = vpop.permute.xlu0 %644  ;;  %v626_v2 = vpop.permute.xlu1 %625 }
 0x63c   :  { %v647_v5 = vadd.f32 %v645_v22, %v575_v41  ;;  %v628_v7 = vmul.f32 %v626_v2, %v622_v3  ;;  %v648_v54 = vadd.f32 %v645_v22, %v2402_v43 }
 0x63e   :  { %v1801_v10 = vmul.f32 -1.442695, %v647_v5  ;;  %630 = vrot.lane.b32.xlu0 %v628_v7, %s2183_s16  ;;  %v1802_v59 = vmul.f32 -1.442695, %v648_v54 }
 0x640   :  { %1894 = vpow2.f32 %v1801_v10 }
 0x646   :  { %v1895_v12 = vpop.eup %1894 }
 0x647   :  { %v655_v14 = vadd.f32 1.0, %v1895_v12 }
 0x649   :  { %1896 = vrcp.f32 %v655_v14  ;;  %v668_v21 = vand.u32 2147483648, %v655_v14  ;;  %v666_v25 = vand.u32 2147483647, %v655_v14  ;;  %vm662_vm11 = vweird.f32 %v655_v14 }
 0x64b   :  { %v669_v29 = vor.u32 1.1754944e-38, %v668_v21  ;;  %vm667_vm13 = vcmp.eq.f32.partialorder %v666_v25, 8.507059e+37 }
 0x64f   :  { %v1897_v18 = vpop.eup %1896 }
 0x650   :  { %v658_v19 = vmul.f32 %v1897_v18, %v655_v14  ;;  %vm663_vm10 = vweird.f32 %v1897_v18 }
 0x651   :  { %vm664_vm12 = vmor %vm662_vm11, %vm663_vm10 }
 0x652   :  { %v659_v20 = vsub.f32 1.0, %v658_v19 }
 0x654   :  { %v660_v23 = vmul.f32 %v1897_v18, %v659_v20 }
 0x656   :  { %v661_v28 = vadd.f32 %v1897_v18, %v660_v23 }
 0x658   :  { %v665_v0 = vsel %vm664_vm12, %v1897_v18, %v661_v28  ;;  %v175_v18 = vpop.f32.mrf.mxu0 }
 0x659   :  { %v670_v32 = vsel %vm667_vm13, %v669_v29, %v665_v0  ;;  %v176_v20 = vadd.f32 %v175_v18, %v2263_v27 }
 0x65a   :  { %v691_v34 = vmul.f32 %v689_v31, %v670_v32 }
 0x65b   :  { %v191_v23 = vmul.f32 0.01, %v176_v20 }
 0x65c   :  { %693 = vrot.lane.b32.xlu1 %v691_v34, %s2183_s16 }
 0x65d   :  { %v199_v28 = vmax.f32 %v176_v20, %v191_v23 }
 0x660   :  { %v178_v19 = vpop.f32.mrf.mxu0 }
 0x661   :  { %v179_v21 = vadd.f32 %v178_v19, %v2263_v27 }
 0x663   :  { %v192_v25 = vmul.f32 0.01, %v179_v21 }
 0x665   :  { %v200_v29 = vmax.f32 %v179_v21, %v192_v25 }
 0x667   :  { %v205_v0 = vpack.c.bf16 %v200_v29, %v199_v28 }
 0x669   :  { %1739 = vmatmul.msk.bf16.gmra.mxu1 %vm219_vm1, %v205_v0 }
 0x6b0   :  { %v631_v35 = vpop.permute.xlu0 %630 }
 0x6b1   :  { %v633_v39 = vadd.f32 %v631_v35, %v247_v52  ;;  %v635_v52 = vsub.f32 1.0, %v622_v3 }
 0x6b3   :  { %1898 = vtanh.f32 %v633_v39 }
 0x6b9   :  { %v1899_v41 = vpop.eup %1898 }
 0x6ba   :  { %637 = vrot.lane.b32.xlu2 %v1899_v41, %s2184_s17 }
 0x6ce   :  { %v694_v47 = vpop.permute.xlu1 %693 }
 0x6cf   :  { %v696_v48 = vadd.f32 %v694_v47, %v2402_v43 }
 0x6d1   :  { %1900 = vtanh.f32 %v696_v48 }
 0x6d2   :  { %1902 = vpow2.f32 %v1802_v59 }
 0x6d7   :  { %v1901_v50 = vpop.eup %1900 }
 0x6d8   :  { %700 = vrot.lane.b32.xlu0 %v1901_v50, %s2184_s17  ;;  %v1903_v60 = vpop.eup %1902 }
 0x6d9   :  { %v656_v61 = vadd.f32 1.0, %v1903_v60 }
 0x6db   :  { %1904 = vrcp.f32 %v656_v61  ;;  %v683_v43 = vand.u32 2147483648, %v656_v61  ;;  %vm677_vm14 = vweird.f32 %v656_v61  ;;  %v681_v57 = vand.u32 2147483647, %v656_v61 }
 0x6dd   :  { %v684_v2 = vor.u32 1.1754944e-38, %v683_v43  ;;  %vm682_vm3 = vcmp.eq.f32.partialorder %v681_v57, 8.507059e+37 }
 0x6e1   :  { %v1905_v37 = vpop.eup %1904 }
 0x6e2   :  { %v673_v62 = vmul.f32 %v1905_v37, %v656_v61  ;;  %vm678_vm0 = vweird.f32 %v1905_v37 }
 0x6e3   :  { %vm679_vm15 = vmor %vm677_vm14, %vm678_vm0 }
 0x6e4   :  { %v674_v63 = vsub.f32 1.0, %v673_v62 }
 0x6e6   :  { %v675_v1 = vmul.f32 %v1905_v37, %v674_v63 }
 0x6e8   :  { %v676_v46 = vadd.f32 %v1905_v37, %v675_v1 }
 0x6ea   :  { %v680_v22 = vsel %vm679_vm15, %v1905_v37, %v676_v46 }
 0x6eb   :  { %v685_v3 = vsel %vm682_vm3, %v684_v2, %v680_v22 }
 0x6ec   :  { %v698_v5 = vsub.f32 1.0, %v685_v3  ;;  %v704_v10 = vmul.f32 %v685_v3, %v2375_v17  ;;  %v181_v17 = vpop.f32.mrf.mxu0 }
 0x6ed   :  { %v182_v31 = vadd.f32 %v181_v17, %v2263_v27 }
 0x6ef   :  { %v193_v32 = vmul.f32 0.01, %v182_v31 }
 0x6f1   :  { %v201_v39 = vmax.f32 %v182_v31, %v193_v32 }
 0x6f4   :  { %v184_v34 = vpop.f32.mrf.mxu0 }
 0x6f5   :  { %v185_v35 = vadd.f32 %v184_v34, %v2263_v27  ;;  %v248_v27 = vpop.f32.mrf.mxu1 }
 0x6f6   :  { %v249_v46 = vadd.f32 %v248_v27, %v2275_v42 }
 0x6f7   :  { %v194_v40 = vmul.f32 0.01, %v185_v35 }
 0x6f9   :  { %v202_v41 = vmax.f32 %v185_v35, %v194_v40 }
 0x6fb   :  { %v206_v44 = vpack.c.bf16 %v202_v41, %v201_v39 }
 0x6fd   :  { %1740 = vmatmul.msk.bf16.gmra.mxu1 %vm219_vm1, %v206_v44  ;;  %v2454_v51 = vpop.f32.mrf.mxu1 }
 0x714   :  { %v638_v53 = vpop.permute.xlu2 %637 }
 0x715   :  { %v640_v56 = vmul.f32 %v638_v53, %v635_v52  ;;  %v2456_v52 = vpop.f32.mrf.mxu1 }
 0x717   :  { %v2421_v58 = vadd.f32 %v641_v55, %v640_v56 }
 0x719   :  { %708 = vrot.lane.b32.xlu1 %v2421_v58, %s2184_s17 }
 0x74a   :  { %v701_v7 = vpop.permute.xlu0 %700 }
 0x74b   :  { %v703_v12 = vmul.f32 %v701_v7, %v698_v5 }
 0x74d   :  { %v2426_v14 = vadd.f32 %v704_v10, %v703_v12 }
 0x74f   :  { %706 = vst.msk [vmem:[#allocation2 + $0x8] sm:$0xff] %vm219_vm1, %v2426_v14  ;;  %712 = vrot.lane.b32.xlu2 %v2426_v14, %s2182_s3 }
 0x77a   :  { %v2458_v53 = vpop.f32.mrf.mxu1 }
 0x782   :  { %v2460_v54 = vpop.f32.mrf.mxu1 }
 0x78b   :  { %v709_v45 = vpop.permute.xlu1 %708 }
 0x7a9   :  { %v713_v47 = vpop.permute.xlu2 %712 }
 0x7aa   :  { %v715_v48 = vsel %vm219_vm1, %v709_v45, %v713_v47 }
 0x7ab   :  { %v716_v50 = vpack.c.bf16 %v715_v48, %v715_v48 }
 0x7ad   :  { %1803 = vmatmul.msk.bf16.vlgmr.msrb.gmra.mxu3 %vm301_vm2, %v716_v50  ;;  %1804 = vmatmul.msk.bf16.vlgmr.msrb.gmra.mxu0 %vm301_vm2, %v716_v50 }
 0x7ae   :  { %1805 = vmatmul.msk.bf16.vlgmr.msrb.gmra.mxu1 %vm301_vm2, %v716_v50  ;;  %1060 = vmatpush.bf16.msrb.mxu3 %v2304_v26 }
 0x7af   :  { %1202 = vmatpush.bf16.msrb.mxu1 %v2280_v4  ;;  %1189 = vmatpush.bf16.msrb.mxu0 %v2239_v8 }
 0x7b2   :  { %1061 = vmatpush.bf16.msrb.mxu3 %v2307_v30 }
 0x7b3   :  { %1203 = vmatpush.bf16.msrb.mxu1 %v2283_v6  ;;  %1190 = vmatpush.bf16.msrb.mxu0 %v2243_v9 }
 0x7b6   :  { %1062 = vmatpush.bf16.msrb.mxu3 %v2312_v33 }
 0x7b7   :  { %1204 = vmatpush.bf16.msrb.mxu1 %v2287_v11  ;;  %1191 = vmatpush.bf16.msrb.mxu0 %v2247_v13 }
 0x7ba   :  { %1063 = vmatpush.bf16.msrb.mxu3 %v2317_v36 }
 0x7bb   :  { %1205 = vmatpush.bf16.msrb.mxu1 %v2291_v15  ;;  %1192 = vmatpush.bf16.msrb.mxu0 %v2253_v16 }
 0x82a   :  { %v742_v55 = vpop.f32.mrf.mxu0 }
 0x82b   :  { %v2463_v56 = vadd.f32 %v742_v55, %v2346_v24  ;;  %v755_v59 = vpop.f32.mrf.mxu1 }
 0x82c   :  { %v756_v60 = vadd.f32 %v755_v59, %v2356_v49 }
 0x82d   :  { %799 = vrot.lane.b32.xlu0 %v2463_v56, %s2182_s3 }
 0x82e   :  { %843 = vrot.lane.b32.xlu2 %v756_v60, %s2184_s17 }
 0x830   :  { %v729_v61 = vpop.f32.mrf.mxu3 }
 0x831   :  { %v730_v37 = vadd.f32 %v729_v61, %v2271_v38 }
 0x832   :  { %v744_v62 = vpop.f32.mrf.mxu0 }
 0x833   :  { %v757_v63 = vpop.f32.mrf.mxu1  ;;  %780 = vrot.lane.b32.xlu1 %v730_v37, %s2183_s16  ;;  %v759_v43 = vadd.f32 %v730_v37, %v249_v46 }
 0x835   :  { %v1806_v57 = vmul.f32 -1.442695, %v759_v43 }
 0x837   :  { %1906 = vpow2.f32 %v1806_v57 }
 0x838   :  { %v731_v1 = vpop.f32.mrf.mxu3 }
 0x83d   :  { %v1907_v22 = vpop.eup %1906 }
 0x83e   :  { %v763_v2 = vadd.f32 1.0, %v1907_v22 }
 0x840   :  { %1908 = vrcp.f32 %v763_v2  ;;  %v775_v19 = vand.u32 2147483648, %v763_v2  ;;  %vm769_vm5 = vweird.f32 %v763_v2  ;;  %v773_v21 = vand.u32 2147483647, %v763_v2 }
 0x842   :  { %v776_v25 = vor.u32 1.1754944e-38, %v775_v19  ;;  %vm774_vm7 = vcmp.eq.f32.partialorder %v773_v21, 8.507059e+37 }
 0x846   :  { %v1909_v3 = vpop.eup %1908 }
 0x847   :  { %v765_v5 = vmul.f32 %v1909_v3, %v763_v2  ;;  %vm770_vm4 = vweird.f32 %v1909_v3 }
 0x848   :  { %vm771_vm6 = vmor %vm769_vm5, %vm770_vm4 }
 0x849   :  { %v766_v7 = vsub.f32 1.0, %v765_v5 }
 0x84b   :  { %v767_v10 = vmul.f32 %v1909_v3, %v766_v7 }
 0x84d   :  { %v768_v12 = vadd.f32 %v1909_v3, %v767_v10 }
 0x84f   :  { %v772_v42 = vsel %vm771_vm6, %v1909_v3, %v768_v12 }
 0x850   :  { %v777_v29 = vsel %vm774_vm7, %v776_v25, %v772_v42 }
 0x851   :  { %v790_v43 = vsub.f32 1.0, %v777_v29  ;;  %v796_v22 = vmul.f32 %v777_v29, %v2421_v58 }
 0x888   :  { %v844_v48 = vpop.permute.xlu2 %843 }
 0x89f   :  { %v800_v18 = vpop.permute.xlu0 %799 }
 0x8a0   :  { %v802_v20 = vadd.f32 %v800_v18, %v730_v37  ;;  %v803_v63 = vadd.f32 %v800_v18, %v2463_v56 }
 0x8a2   :  { %v1807_v23 = vmul.f32 -1.442695, %v802_v20  ;;  %v1808_v1 = vmul.f32 -1.442695, %v803_v63 }
 0x8a4   :  { %1910 = vpow2.f32 %v1807_v23 }
 0x8a5   :  { %v781_v28 = vpop.permute.xlu1 %780 }
 0x8a6   :  { %v783_v17 = vmul.f32 %v781_v28, %v777_v29 }
 0x8a8   :  { %785 = vrot.lane.b32.xlu0 %v783_v17, %s2183_s16 }
 0x8aa   :  { %v1911_v0 = vpop.eup %1910 }
 0x8ab   :  { %v810_v31 = vadd.f32 1.0, %v1911_v0 }
 0x8ad   :  { %1912 = vrcp.f32 %v810_v31  ;;  %v823_v39 = vand.u32 2147483648, %v810_v31  ;;  %v821_v41 = vand.u32 2147483647, %v810_v31  ;;  %vm817_vm9 = vweird.f32 %v810_v31 }
 0x8af   :  { %v824_v45 = vor.u32 1.1754944e-38, %v823_v39  ;;  %vm822_vm11 = vcmp.eq.f32.partialorder %v821_v41, 8.507059e+37 }
 0x8b3   :  { %v1913_v32 = vpop.eup %1912 }
 0x8b4   :  { %v813_v34 = vmul.f32 %v1913_v32, %v810_v31  ;;  %vm818_vm8 = vweird.f32 %v1913_v32 }
 0x8b5   :  { %vm819_vm10 = vmor %vm817_vm9, %vm818_vm8 }
 0x8b6   :  { %v814_v35 = vsub.f32 1.0, %v813_v34 }
 0x8b8   :  { %v815_v40 = vmul.f32 %v1913_v32, %v814_v35 }
 0x8ba   :  { %v816_v44 = vadd.f32 %v1913_v32, %v815_v40 }
 0x8bc   :  { %v820_v47 = vsel %vm819_vm10, %v1913_v32, %v816_v44 }
 0x8bd   :  { %v825_v50 = vsel %vm822_vm11, %v824_v45, %v820_v47 }
 0x8be   :  { %v846_v27 = vmul.f32 %v844_v48, %v825_v50  ;;  %v2515_v50 = vld [vmem:[#allocation8 + $0x33] ss:$0 sm:$0xff] }
 0x8c0   :  { %848 = vrot.lane.b32.xlu1 %v846_v27, %s2183_s16  ;;  %v252_v27 = vadd.f32 %v2515_v50, %v2454_v51 }
 0x91a   :  { %v786_v55 = vpop.permute.xlu0 %785 }
 0x91b   :  { %v788_v59 = vadd.f32 %v786_v55, %v249_v46 }
 0x91d   :  { %1914 = vtanh.f32 %v788_v59 }
 0x923   :  { %v1915_v60 = vpop.eup %1914 }
 0x924   :  { %792 = vrot.lane.b32.xlu2 %v1915_v60, %s2184_s17 }
 0x932   :  { %v849_v61 = vpop.permute.xlu1 %848 }
 0x933   :  { %v851_v37 = vadd.f32 %v849_v61, %v2463_v56 }
 0x935   :  { %1916 = vtanh.f32 %v851_v37 }
 0x936   :  { %1918 = vpow2.f32 %v1808_v1 }
 0x93b   :  { %v1917_v62 = vpop.eup %1916 }
 0x93c   :  { %855 = vrot.lane.b32.xlu0 %v1917_v62, %s2184_s17  ;;  %v1919_v3 = vpop.eup %1918 }
 0x93d   :  { %v811_v5 = vadd.f32 1.0, %v1919_v3 }
 0x93f   :  { %1920 = vrcp.f32 %v811_v5  ;;  %v838_v18 = vand.u32 2147483648, %v811_v5  ;;  %vm832_vm13 = vweird.f32 %v811_v5  ;;  %v836_v20 = vand.u32 2147483647, %v811_v5 }
 0x941   :  { %v839_v21 = vor.u32 1.1754944e-38, %v838_v18  ;;  %vm837_vm14 = vcmp.eq.f32.partialorder %v836_v20, 8.507059e+37 }
 0x945   :  { %v1921_v7 = vpop.eup %1920 }
 0x946   :  { %v828_v10 = vmul.f32 %v1921_v7, %v811_v5  ;;  %vm833_vm12 = vweird.f32 %v1921_v7 }
 0x947   :  { %vm834_vm0 = vmor %vm832_vm13, %vm833_vm12 }
 0x948   :  { %v829_v12 = vsub.f32 1.0, %v828_v10 }
 0x94a   :  { %v830_v19 = vmul.f32 %v1921_v7, %v829_v12 }
 0x94c   :  { %v831_v56 = vadd.f32 %v1921_v7, %v830_v19 }
 0x94e   :  { %v835_v58 = vsel %vm834_vm0, %v1921_v7, %v831_v56 }
 0x94f   :  { %v840_v23 = vsel %vm837_vm14, %v839_v21, %v835_v58 }
 0x950   :  { %v853_v42 = vsub.f32 1.0, %v840_v23  ;;  %v859_v28 = vmul.f32 %v840_v23, %v2426_v14 }
 0x97e   :  { %v793_v57 = vpop.permute.xlu2 %792 }
 0x97f   :  { %v795_v2 = vmul.f32 %v793_v57, %v790_v43 }
 0x981   :  { %v2479_v46 = vadd.f32 %v796_v22, %v795_v2 }
 0x983   :  { %863 = vrot.lane.b32.xlu1 %v2479_v46, %s2184_s17 }
 0x9ae   :  { %v856_v25 = vpop.permute.xlu0 %855 }
 0x9af   :  { %v858_v29 = vmul.f32 %v856_v25, %v853_v42 }
 0x9b1   :  { %v2484_v17 = vadd.f32 %v859_v28, %v858_v29 }
 0x9b3   :  { %861 = vst.msk [vmem:[#allocation2 + $0x10] sm:$0xff] %vm219_vm1, %v2484_v17  ;;  %867 = vrot.lane.b32.xlu2 %v2484_v17, %s2182_s3 }
 0x9f5   :  { %v864_v0 = vpop.permute.xlu1 %863 }
 0xa0d   :  { %v868_v31 = vpop.permute.xlu2 %867 }
 0xa0e   :  { %v870_v32 = vsel %vm219_vm1, %v864_v0, %v868_v31 }
 0xa0f   :  { %v871_v34 = vpack.c.bf16 %v870_v32, %v870_v32 }
 0xa11   :  { %1809 = vmatmul.msk.bf16.vlgmr.msra.gmra.mxu2 %vm301_vm2, %v871_v34  ;;  %1810 = vmatmul.msk.bf16.vlgmr.msra.gmra.mxu3 %vm301_vm2, %v871_v34 }
 0xa12   :  { %1811 = vmatmul.msk.bf16.vlgmr.msra.gmra.mxu0 %vm301_vm2, %v871_v34  ;;  %1215 = vmatpush.bf16.msra.mxu2 %v2304_v26 }
 0xa13   :  { %1357 = vmatpush.bf16.msra.mxu0 %v2280_v4  ;;  %1344 = vmatpush.bf16.msra.mxu3 %v2239_v8 }
 0xa16   :  { %1216 = vmatpush.bf16.msra.mxu2 %v2307_v30 }
 0xa17   :  { %1358 = vmatpush.bf16.msra.mxu0 %v2283_v6  ;;  %1345 = vmatpush.bf16.msra.mxu3 %v2243_v9 }
 0xa1a   :  { %1217 = vmatpush.bf16.msra.mxu2 %v2312_v33 }
 0xa1b   :  { %1359 = vmatpush.bf16.msra.mxu0 %v2287_v11  ;;  %1346 = vmatpush.bf16.msra.mxu3 %v2247_v13 }
 0xa1e   :  { %1218 = vmatpush.bf16.msra.mxu2 %v2317_v36 }
 0xa1f   :  { %1360 = vmatpush.bf16.msra.mxu0 %v2291_v15  ;;  %1347 = vmatpush.bf16.msra.mxu3 %v2253_v16 }
 0xa8f   :  { %v910_v14 = vpop.f32.mrf.mxu0 }
 0xa90   :  { %v911_v35 = vadd.f32 %v910_v14, %v2356_v49 }
 0xa92   :  { %998 = vrot.lane.b32.xlu2 %v911_v35, %s2184_s17 }
 0xa94   :  { %v884_v39 = vpop.f32.mrf.mxu2  ;;  %v897_v40 = vpop.f32.mrf.mxu3 }
 0xa95   :  { %v885_v41 = vadd.f32 %v884_v39, %v2271_v38  ;;  %v2510_v44 = vadd.f32 %v897_v40, %v2346_v24 }
 0xa97   :  { %v912_v45 = vpop.f32.mrf.mxu0  ;;  %954 = vrot.lane.b32.xlu0 %v2510_v44, %s2182_s3  ;;  %935 = vrot.lane.b32.xlu1 %v885_v41, %s2183_s16  ;;  %v914_v55 = vadd.f32 %v885_v41, %v252_v27 }
 0xa99   :  { %v1812_v59 = vmul.f32 -1.442695, %v914_v55 }
 0xa9b   :  { %1922 = vpow2.f32 %v1812_v59 }
 0xa9c   :  { %v886_v47 = vpop.f32.mrf.mxu2  ;;  %v899_v48 = vpop.f32.mrf.mxu3 }
 0xaa1   :  { %v1923_v60 = vpop.eup %1922 }
 0xaa2   :  { %v918_v61 = vadd.f32 1.0, %v1923_v60 }
 0xaa4   :  { %1924 = vrcp.f32 %v918_v61  ;;  %v930_v57 = vand.u32 2147483648, %v918_v61  ;;  %vm924_vm3 = vweird.f32 %v918_v61  ;;  %v928_v22 = vand.u32 2147483647, %v918_v61 }
 0xaa6   :  { %v931_v3 = vor.u32 1.1754944e-38, %v930_v57  ;;  %vm929_vm5 = vcmp.eq.f32.partialorder %v928_v22, 8.507059e+37 }
 0xaaa   :  { %v1925_v37 = vpop.eup %1924 }
 0xaab   :  { %v920_v62 = vmul.f32 %v1925_v37, %v918_v61  ;;  %vm925_vm15 = vweird.f32 %v1925_v37 }
 0xaac   :  { %vm926_vm4 = vmor %vm924_vm3, %vm925_vm15 }
 0xaad   :  { %v921_v63 = vsub.f32 1.0, %v920_v62 }
 0xaaf   :  { %v922_v1 = vmul.f32 %v1925_v37, %v921_v63 }
 0xab1   :  { %v923_v43 = vadd.f32 %v1925_v37, %v922_v1 }
 0xab3   :  { %v927_v2 = vsel %vm926_vm4, %v1925_v37, %v923_v43 }
 0xab4   :  { %v932_v7 = vsel %vm929_vm5, %v931_v3, %v927_v2 }
 0xab5   :  { %v945_v47 = vsub.f32 1.0, %v932_v7  ;;  %v951_v59 = vmul.f32 %v932_v7, %v2479_v46 }
 0xaec   :  { %v999_v31 = vpop.permute.xlu2 %998 }
 0xb09   :  { %v955_v51 = vpop.permute.xlu0 %954  ;;  %v936_v5 = vpop.permute.xlu1 %935 }
 0xb0a   :  { %v957_v10 = vadd.f32 %v955_v51, %v885_v41  ;;  %v938_v12 = vmul.f32 %v936_v5, %v932_v7  ;;  %v958_v55 = vadd.f32 %v955_v51, %v2510_v44 }
 0xb0c   :  { %v1813_v19 = vmul.f32 -1.442695, %v957_v10  ;;  %940 = vrot.lane.b32.xlu0 %v938_v12, %s2183_s16 }
 0xb0e   :  { %1926 = vpow2.f32 %v1813_v19 }
 0xb14   :  { %v1927_v56 = vpop.eup %1926 }
 0xb15   :  { %v965_v18 = vadd.f32 1.0, %v1927_v56 }
 0xb17   :  { %1928 = vrcp.f32 %v965_v18  ;;  %v978_v23 = vand.u32 2147483648, %v965_v18  ;;  %v976_v25 = vand.u32 2147483647, %v965_v18  ;;  %vm972_vm7 = vweird.f32 %v965_v18 }
 0xb19   :  { %v979_v29 = vor.u32 1.1754944e-38, %v978_v23  ;;  %vm977_vm9 = vcmp.eq.f32.partialorder %v976_v25, 8.507059e+37 }
 0xb1d   :  { %v1929_v20 = vpop.eup %1928 }
 0xb1e   :  { %v968_v58 = vmul.f32 %v1929_v20, %v965_v18  ;;  %vm973_vm6 = vweird.f32 %v1929_v20 }
 0xb1f   :  { %vm974_vm8 = vmor %vm972_vm7, %vm973_vm6 }
 0xb20   :  { %v969_v21 = vsub.f32 1.0, %v968_v58 }
 0xb22   :  { %v970_v42 = vmul.f32 %v1929_v20, %v969_v21 }
 0xb24   :  { %v971_v28 = vadd.f32 %v1929_v20, %v970_v42 }
 0xb26   :  { %v975_v0 = vsel %vm974_vm8, %v1929_v20, %v971_v28 }
 0xb27   :  { %v980_v32 = vsel %vm977_vm9, %v979_v29, %v975_v0 }
 0xb28   :  { %v1001_v34 = vmul.f32 %v999_v31, %v980_v32 }
 0xb2a   :  { %1003 = vrot.lane.b32.xlu1 %v1001_v34, %s2183_s16 }
 0xb7e   :  { %v941_v14 = vpop.permute.xlu0 %940 }
 0xb7f   :  { %v943_v35 = vadd.f32 %v941_v14, %v252_v27  ;;  %v1814_v27 = vmul.f32 -1.442695, %v958_v55 }
 0xb81   :  { %1930 = vtanh.f32 %v943_v35 }
 0xb87   :  { %v1931_v39 = vpop.eup %1930 }
 0xb88   :  { %947 = vrot.lane.b32.xlu2 %v1931_v39, %s2184_s17 }
 0xb9c   :  { %v1004_v40 = vpop.permute.xlu1 %1003 }
 0xb9d   :  { %v1006_v41 = vadd.f32 %v1004_v40, %v2510_v44 }
 0xb9f   :  { %1932 = vtanh.f32 %v1006_v41 }
 0xba0   :  { %1934 = vpow2.f32 %v1814_v27 }
 0xba5   :  { %v1933_v45 = vpop.eup %1932 }
 0xba6   :  { %1010 = vrot.lane.b32.xlu0 %v1933_v45, %s2184_s17  ;;  %v1935_v37 = vpop.eup %1934 }
 0xba7   :  { %v966_v62 = vadd.f32 1.0, %v1935_v37 }
 0xba9   :  { %1936 = vrcp.f32 %v966_v62  ;;  %v993_v44 = vand.u32 2147483648, %v966_v62  ;;  %vm987_vm11 = vweird.f32 %v966_v62  ;;  %v991_v46 = vand.u32 2147483647, %v966_v62 }
 0xbab   :  { %v994_v3 = vor.u32 1.1754944e-38, %v993_v44  ;;  %vm992_vm13 = vcmp.eq.f32.partialorder %v991_v46, 8.507059e+37 }
 0xbaf   :  { %v1937_v63 = vpop.eup %1936 }
 0xbb0   :  { %v983_v1 = vmul.f32 %v1937_v63, %v966_v62  ;;  %vm988_vm10 = vweird.f32 %v1937_v63 }
 0xbb1   :  { %vm989_vm12 = vmor %vm987_vm11, %vm988_vm10 }
 0xbb2   :  { %v984_v43 = vsub.f32 1.0, %v983_v1 }
 0xbb4   :  { %v985_v57 = vmul.f32 %v1937_v63, %v984_v43 }
 0xbb6   :  { %v986_v22 = vadd.f32 %v1937_v63, %v985_v57 }
 0xbb8   :  { %v990_v2 = vsel %vm989_vm12, %v1937_v63, %v986_v22 }
 0xbb9   :  { %v995_v51 = vsel %vm992_vm13, %v994_v3, %v990_v2 }
 0xbba   :  { %v1008_v5 = vsub.f32 1.0, %v995_v51  ;;  %v1014_v10 = vmul.f32 %v995_v51, %v2484_v17 }
 0xbe2   :  { %v948_v48 = vpop.permute.xlu2 %947 }
 0xbe3   :  { %v950_v60 = vmul.f32 %v948_v48, %v945_v47 }
 0xbe5   :  { %v2526_v61 = vadd.f32 %v951_v59, %v950_v60 }
 0xbe7   :  { %1018 = vrot.lane.b32.xlu1 %v2526_v61, %s2184_s17 }
 0xc18   :  { %v1011_v7 = vpop.permute.xlu0 %1010 }
 0xc19   :  { %v1013_v12 = vmul.f32 %v1011_v7, %v1008_v5 }
 0xc1b   :  { %v2531_v19 = vadd.f32 %v1014_v10, %v1013_v12 }
 0xc1d   :  { %1016 = vst.msk [vmem:[#allocation2 + $0x18] sm:$0xff] %vm219_vm1, %v2531_v19  ;;  %1022 = vrot.lane.b32.xlu2 %v2531_v19, %s2182_s3 }
 0xc59   :  { %v1019_v56 = vpop.permute.xlu1 %1018 }
 0xc77   :  { %v1023_v18 = vpop.permute.xlu2 %1022 }
 0xc78   :  { %v1025_v20 = vsel %vm219_vm1, %v1019_v56, %v1023_v18 }
 0xc79   :  { %v1026_v58 = vpack.c.bf16 %v1025_v20, %v1025_v20 }
 0xc7b   :  { %1815 = vmatmul.msk.bf16.vlgmr.msra.gmra.mxu1 %vm301_vm2, %v1026_v58  ;;  %1816 = vmatmul.msk.bf16.vlgmr.msrb.gmra.mxu2 %vm301_vm2, %v1026_v58 }
 0xc7c   :  { %1817 = vmatmul.msk.bf16.vlgmr.msrb.gmra.mxu3 %vm301_vm2, %v1026_v58  ;;  %1370 = vmatpush.bf16.msra.mxu1 %v2304_v26 }
 0xc7d   :  { %1512 = vmatpush.bf16.msrb.mxu3 %v2280_v4  ;;  %1499 = vmatpush.bf16.msrb.mxu2 %v2239_v8 }
 0xc80   :  { %1371 = vmatpush.bf16.msra.mxu1 %v2307_v30 }
 0xc81   :  { %1513 = vmatpush.bf16.msrb.mxu3 %v2283_v6  ;;  %1500 = vmatpush.bf16.msrb.mxu2 %v2243_v9 }
 0xc84   :  { %1372 = vmatpush.bf16.msra.mxu1 %v2312_v33 }
 0xc85   :  { %1514 = vmatpush.bf16.msrb.mxu3 %v2287_v11  ;;  %1501 = vmatpush.bf16.msrb.mxu2 %v2247_v13 }
 0xc88   :  { %1373 = vmatpush.bf16.msra.mxu1 %v2317_v36 }
 0xc89   :  { %1515 = vmatpush.bf16.msrb.mxu3 %v2291_v15  ;;  %1502 = vmatpush.bf16.msrb.mxu2 %v2253_v16  ;;  %v254_v15 = vadd.f32 %v2515_v50, %v2456_v52 }
 0xcf8   :  { %v1039_v4 = vpop.f32.mrf.mxu1 }
 0xcf9   :  { %v1040_v8 = vadd.f32 %v1039_v4, %v2271_v38 }
 0xcfb   :  { %1090 = vrot.lane.b32.xlu1 %v1040_v8, %s2183_s16  ;;  %v1069_v23 = vadd.f32 %v1040_v8, %v254_v15 }
 0xcfd   :  { %v1818_v42 = vmul.f32 -1.442695, %v1069_v23 }
 0xcfe   :  { %v1052_v6 = vpop.f32.mrf.mxu2 }
 0xcff   :  { %v2556_v9 = vadd.f32 %v1052_v6, %v2346_v24  ;;  %v1065_v17 = vpop.f32.mrf.mxu3  ;;  %1938 = vpow2.f32 %v1818_v42 }
 0xd00   :  { %v1066_v11 = vadd.f32 %v1065_v17, %v2356_v49  ;;  %v1041_v21 = vpop.f32.mrf.mxu1 }
 0xd01   :  { %1109 = vrot.lane.b32.xlu0 %v2556_v9, %s2182_s3 }
 0xd02   :  { %1153 = vrot.lane.b32.xlu2 %v1066_v11, %s2184_s17 }
 0xd05   :  { %v1939_v25 = vpop.eup %1938 }
 0xd06   :  { %v1054_v13 = vpop.f32.mrf.mxu2  ;;  %v1073_v28 = vadd.f32 1.0, %v1939_v25 }
 0xd07   :  { %v1067_v16 = vpop.f32.mrf.mxu3 }
 0xd08   :  { %1940 = vrcp.f32 %v1073_v28  ;;  %v1085_v14 = vand.u32 2147483648, %v1073_v28  ;;  %vm1079_vm14 = vweird.f32 %v1073_v28  ;;  %v1083_v35 = vand.u32 2147483647, %v1073_v28 }
 0xd0a   :  { %v1086_v40 = vor.u32 1.1754944e-38, %v1085_v14  ;;  %vm1084_vm3 = vcmp.eq.f32.partialorder %v1083_v35, 8.507059e+37 }
 0xd0e   :  { %v1941_v29 = vpop.eup %1940 }
 0xd0f   :  { %v1075_v0 = vmul.f32 %v1941_v29, %v1073_v28  ;;  %vm1080_vm0 = vweird.f32 %v1941_v29 }
 0xd10   :  { %vm1081_vm15 = vmor %vm1079_vm14, %vm1080_vm0 }
 0xd11   :  { %v1076_v31 = vsub.f32 1.0, %v1075_v0 }
 0xd13   :  { %v1077_v32 = vmul.f32 %v1941_v29, %v1076_v31 }
 0xd15   :  { %v1078_v34 = vadd.f32 %v1941_v29, %v1077_v32 }
 0xd17   :  { %v1082_v39 = vsel %vm1081_vm15, %v1941_v29, %v1078_v34 }
 0xd18   :  { %v1087_v41 = vsel %vm1084_vm3, %v1086_v40, %v1082_v39 }
 0xd19   :  { %v1100_v18 = vsub.f32 1.0, %v1087_v41  ;;  %v1106_v58 = vmul.f32 %v1087_v41, %v2526_v61 }
 0xd5c   :  { %v1154_v46 = vpop.permute.xlu2 %1153 }
 0xd6d   :  { %v1091_v52 = vpop.permute.xlu1 %1090 }
 0xd6e   :  { %v1093_v45 = vmul.f32 %v1091_v52, %v1087_v41 }
 0xd70   :  { %1095 = vrot.lane.b32.xlu0 %v1093_v45, %s2183_s16 }
 0xd73   :  { %v1110_v47 = vpop.permute.xlu0 %1109 }
 0xd74   :  { %v1112_v48 = vadd.f32 %v1110_v47, %v1040_v8  ;;  %v1113_v6 = vadd.f32 %v1110_v47, %v2556_v9 }
 0xd76   :  { %v1819_v55 = vmul.f32 -1.442695, %v1112_v48  ;;  %v1820_v17 = vmul.f32 -1.442695, %v1113_v6 }
 0xd78   :  { %1942 = vpow2.f32 %v1819_v55 }
 0xd7e   :  { %v1943_v59 = vpop.eup %1942 }
 0xd7f   :  { %v1120_v60 = vadd.f32 1.0, %v1943_v59 }
 0xd81   :  { %1944 = vrcp.f32 %v1120_v60  ;;  %v1133_v63 = vand.u32 2147483648, %v1120_v60  ;;  %v1131_v43 = vand.u32 2147483647, %v1120_v60  ;;  %vm1127_vm5 = vweird.f32 %v1120_v60 }
 0xd83   :  { %v1134_v22 = vor.u32 1.1754944e-38, %v1133_v63  ;;  %vm1132_vm7 = vcmp.eq.f32.partialorder %v1131_v43, 8.507059e+37 }
 0xd87   :  { %v1945_v27 = vpop.eup %1944 }
 0xd88   :  { %v1123_v37 = vmul.f32 %v1945_v27, %v1120_v60  ;;  %vm1128_vm4 = vweird.f32 %v1945_v27 }
 0xd89   :  { %vm1129_vm6 = vmor %vm1127_vm5, %vm1128_vm4 }
 0xd8a   :  { %v1124_v62 = vsub.f32 1.0, %v1123_v37 }
 0xd8c   :  { %v1125_v1 = vmul.f32 %v1945_v27, %v1124_v62 }
 0xd8e   :  { %v1126_v57 = vadd.f32 %v1945_v27, %v1125_v1 }
 0xd90   :  { %v1130_v44 = vsel %vm1129_vm6, %v1945_v27, %v1126_v57 }
 0xd91   :  { %v1135_v2 = vsel %vm1132_vm7, %v1134_v22, %v1130_v44 }
 0xd92   :  { %v1156_v3 = vmul.f32 %v1154_v46, %v1135_v2 }
 0xd94   :  { %1158 = vrot.lane.b32.xlu1 %v1156_v3, %s2183_s16 }
 0xde2   :  { %v1096_v51 = vpop.permute.xlu0 %1095 }
 0xde3   :  { %v1098_v5 = vadd.f32 %v1096_v51, %v254_v15 }
 0xde5   :  { %1946 = vtanh.f32 %v1098_v5 }
 0xdeb   :  { %v1947_v7 = vpop.eup %1946 }
 0xdec   :  { %1102 = vrot.lane.b32.xlu2 %v1947_v7, %s2184_s17 }
 0xe06   :  { %v1159_v10 = vpop.permute.xlu1 %1158 }
 0xe07   :  { %v1161_v12 = vadd.f32 %v1159_v10, %v2556_v9 }
 0xe09   :  { %1948 = vtanh.f32 %v1161_v12 }
 0xe0a   :  { %1950 = vpow2.f32 %v1820_v17 }
 0xe0f   :  { %v1949_v56 = vpop.eup %1948 }
 0xe10   :  { %1165 = vrot.lane.b32.xlu0 %v1949_v56, %s2184_s17  ;;  %v1951_v11 = vpop.eup %1950 }
 0xe11   :  { %v1121_v21 = vadd.f32 1.0, %v1951_v11 }
 0xe13   :  { %1952 = vrcp.f32 %v1121_v21  ;;  %v1148_v61 = vand.u32 2147483648, %v1121_v21  ;;  %vm1142_vm9 = vweird.f32 %v1121_v21  ;;  %v1146_v25 = vand.u32 2147483647, %v1121_v21 }
 0xe15   :  { %v1149_v29 = vor.u32 1.1754944e-38, %v1148_v61  ;;  %vm1147_vm11 = vcmp.eq.f32.partialorder %v1146_v25, 8.507059e+37 }
 0xe19   :  { %v1953_v13 = vpop.eup %1952 }
 0xe1a   :  { %v1138_v16 = vmul.f32 %v1953_v13, %v1121_v21  ;;  %vm1143_vm8 = vweird.f32 %v1953_v13 }
 0xe1b   :  { %vm1144_vm10 = vmor %vm1142_vm9, %vm1143_vm8 }
 0xe1c   :  { %v1139_v15 = vsub.f32 1.0, %v1138_v16 }
 0xe1e   :  { %v1140_v23 = vmul.f32 %v1953_v13, %v1139_v15 }
 0xe20   :  { %v1141_v42 = vadd.f32 %v1953_v13, %v1140_v23 }
 0xe22   :  { %v1145_v28 = vsel %vm1144_vm10, %v1953_v13, %v1141_v42 }
 0xe23   :  { %v1150_v0 = vsel %vm1147_vm11, %v1149_v29, %v1145_v28 }
 0xe24   :  { %v1163_v9 = vsub.f32 1.0, %v1150_v0  ;;  %v1169_v32 = vmul.f32 %v1150_v0, %v2531_v19 }
 0xe46   :  { %v1103_v20 = vpop.permute.xlu2 %1102 }
 0xe47   :  { %v1105_v4 = vmul.f32 %v1103_v20, %v1100_v18 }
 0xe49   :  { %v2570_v8 = vadd.f32 %v1106_v58, %v1105_v4 }
 0xe4b   :  { %1173 = vrot.lane.b32.xlu1 %v2570_v8, %s2184_s17 }
 0xe82   :  { %v1166_v31 = vpop.permute.xlu0 %1165 }
 0xe83   :  { %v1168_v34 = vmul.f32 %v1166_v31, %v1163_v9 }
 0xe85   :  { %v2576_v14 = vadd.f32 %v1169_v32, %v1168_v34 }
 0xe87   :  { %1171 = vst.msk [vmem:[#allocation2 + $0x20] sm:$0xff] %vm219_vm1, %v2576_v14  ;;  %1177 = vrot.lane.b32.xlu2 %v2576_v14, %s2182_s3 }
 0xebd   :  { %v1174_v35 = vpop.permute.xlu1 %1173 }
 0xee1   :  { %v1178_v39 = vpop.permute.xlu2 %1177 }
 0xee2   :  { %v1180_v40 = vsel %vm219_vm1, %v1174_v35, %v1178_v39 }
 0xee3   :  { %v1181_v52 = vpack.c.bf16 %v1180_v40, %v1180_v40 }
 0xee5   :  { %1821 = vmatmul.msk.bf16.vlgmr.msrb.gmra.mxu0 %vm301_vm2, %v1181_v52  ;;  %1822 = vmatmul.msk.bf16.vlgmr.msrb.gmra.mxu1 %vm301_vm2, %v1181_v52 }
 0xee6   :  { %1823 = vmatmul.msk.bf16.vlgmr.msra.gmra.mxu2 %vm301_vm2, %v1181_v52  ;;  %1525 = vmatpush.bf16.msrb.mxu0 %v2304_v26 }
 0xeea   :  { %1526 = vmatpush.bf16.msrb.mxu0 %v2307_v30 }
 0xeee   :  { %1527 = vmatpush.bf16.msrb.mxu0 %v2312_v33 }
 0xef2   :  { %1528 = vmatpush.bf16.msrb.mxu0 %v2317_v36  ;;  %v257_v36 = vadd.f32 %v2515_v50, %v2458_v53 }
 0xf62   :  { %v1194_v19 = vpop.f32.mrf.mxu0  ;;  %v1207_v41 = vpop.f32.mrf.mxu1 }
 0xf63   :  { %v1195_v45 = vadd.f32 %v1194_v19, %v2271_v38  ;;  %v2592_v47 = vadd.f32 %v1207_v41, %v2346_v24 }
 0xf65   :  { %1264 = vrot.lane.b32.xlu0 %v2592_v47, %s2182_s3  ;;  %1245 = vrot.lane.b32.xlu1 %v1195_v45, %s2183_s16  ;;  %v1224_v59 = vadd.f32 %v1195_v45, %v257_v36 }
 0xf67   :  { %v1824_v60 = vmul.f32 -1.442695, %v1224_v59 }
 0xf69   :  { %v1220_v48 = vpop.f32.mrf.mxu2  ;;  %1954 = vpow2.f32 %v1824_v60 }
 0xf6a   :  { %v1221_v26 = vadd.f32 %v1220_v48, %v2356_v49  ;;  %v1196_v30 = vpop.f32.mrf.mxu0  ;;  %v1209_v55 = vpop.f32.mrf.mxu1 }
 0xf6c   :  { %1308 = vrot.lane.b32.xlu2 %v1221_v26, %s2184_s17 }
 0xf6f   :  { %v1955_v27 = vpop.eup %1954 }
 0xf70   :  { %v1228_v37 = vadd.f32 1.0, %v1955_v27 }
 0xf71   :  { %v1222_v33 = vpop.f32.mrf.mxu2 }
 0xf72   :  { %1956 = vrcp.f32 %v1228_v37  ;;  %v1240_v22 = vand.u32 2147483648, %v1228_v37  ;;  %vm1234_vm13 = vweird.f32 %v1228_v37  ;;  %v1238_v44 = vand.u32 2147483647, %v1228_v37 }
 0xf74   :  { %v1241_v2 = vor.u32 1.1754944e-38, %v1240_v22  ;;  %vm1239_vm14 = vcmp.eq.f32.partialorder %v1238_v44, 8.507059e+37 }
 0xf78   :  { %v1957_v62 = vpop.eup %1956 }
 0xf79   :  { %v1230_v63 = vmul.f32 %v1957_v62, %v1228_v37  ;;  %vm1235_vm12 = vweird.f32 %v1957_v62 }
 0xf7a   :  { %vm1236_vm0 = vmor %vm1234_vm13, %vm1235_vm12 }
 0xf7b   :  { %v1231_v1 = vsub.f32 1.0, %v1230_v63 }
 0xf7d   :  { %v1232_v43 = vmul.f32 %v1957_v62, %v1231_v1 }
 0xf7f   :  { %v1233_v57 = vadd.f32 %v1957_v62, %v1232_v43 }
 0xf81   :  { %v1237_v46 = vsel %vm1236_vm0, %v1957_v62, %v1233_v57 }
 0xf82   :  { %v1242_v51 = vsel %vm1239_vm14, %v1241_v2, %v1237_v46 }
 0xf83   :  { %v1255_v9 = vsub.f32 1.0, %v1242_v51  ;;  %v1261_v34 = vmul.f32 %v1242_v51, %v2570_v8 }
 0xfc6   :  { %v1309_v16 = vpop.permute.xlu2 %1308 }
 0xfd7   :  { %v1265_v53 = vpop.permute.xlu0 %1264  ;;  %v1246_v3 = vpop.permute.xlu1 %1245 }
 0xfd8   :  { %v1267_v5 = vadd.f32 %v1265_v53, %v1195_v45  ;;  %v1248_v7 = vmul.f32 %v1246_v3, %v1242_v51  ;;  %v1268_v32 = vadd.f32 %v1265_v53, %v2592_v47 }
 0xfda   :  { %v1825_v10 = vmul.f32 -1.442695, %v1267_v5  ;;  %1250 = vrot.lane.b32.xlu0 %v1248_v7, %s2183_s16  ;;  %v1826_v40 = vmul.f32 -1.442695, %v1268_v32  ;;  %v259_v7 = vadd.f32 %v2515_v50, %v2460_v54 }
 0xfdc   :  { %1958 = vpow2.f32 %v1825_v10 }
 0xfe2   :  { %v1959_v12 = vpop.eup %1958 }
 0xfe3   :  { %v1275_v56 = vadd.f32 1.0, %v1959_v12 }
 0xfe5   :  { %1960 = vrcp.f32 %v1275_v56  ;;  %v1288_v4 = vand.u32 2147483648, %v1275_v56  ;;  %v1286_v17 = vand.u32 2147483647, %v1275_v56  ;;  %vm1282_vm3 = vweird.f32 %v1275_v56 }
 0xfe7   :  { %v1289_v21 = vor.u32 1.1754944e-38, %v1288_v4  ;;  %vm1287_vm5 = vcmp.eq.f32.partialorder %v1286_v17, 8.507059e+37 }
 0xfeb   :  { %v1961_v18 = vpop.eup %1960 }
 0xfec   :  { %v1278_v20 = vmul.f32 %v1961_v18, %v1275_v56  ;;  %vm1283_vm15 = vweird.f32 %v1961_v18 }
 0xfed   :  { %vm1284_vm4 = vmor %vm1282_vm3, %vm1283_vm15 }
 0xfee   :  { %v1279_v58 = vsub.f32 1.0, %v1278_v20 }
 0xff0   :  { %v1280_v6 = vmul.f32 %v1961_v18, %v1279_v58 }
 0xff2   :  { %v1281_v11 = vadd.f32 %v1961_v18, %v1280_v6 }
 0xff4   :  { %v1285_v13 = vsel %vm1284_vm4, %v1961_v18, %v1281_v11 }
 0xff5   :  { %v1290_v15 = vsel %vm1287_vm5, %v1289_v21, %v1285_v13 }
 0xff6   :  { %v1311_v23 = vmul.f32 %v1309_v16, %v1290_v15 }
 0xff8   :  { %1313 = vrot.lane.b32.xlu1 %v1311_v23, %s2183_s16 }
0x104c   :  { %v1251_v42 = vpop.permute.xlu0 %1250 }
0x104d   :  { %v1253_v61 = vadd.f32 %v1251_v42, %v257_v36 }
0x104f   :  { %1962 = vtanh.f32 %v1253_v61 }
0x1055   :  { %v1963_v25 = vpop.eup %1962 }
0x1056   :  { %1257 = vrot.lane.b32.xlu2 %v1963_v25, %s2184_s17 }
0x106a   :  { %v1314_v28 = vpop.permute.xlu1 %1313 }
0x106b   :  { %v1316_v29 = vadd.f32 %v1314_v28, %v2592_v47 }
0x106d   :  { %1964 = vtanh.f32 %v1316_v29 }
0x106e   :  { %1966 = vpow2.f32 %v1826_v40 }
0x1073   :  { %v1965_v0 = vpop.eup %1964 }
0x1074   :  { %1320 = vrot.lane.b32.xlu0 %v1965_v0, %s2184_s17  ;;  %v1967_v52 = vpop.eup %1966 }
0x1075   :  { %v1276_v19 = vadd.f32 1.0, %v1967_v52 }
0x1077   :  { %1968 = vrcp.f32 %v1276_v19  ;;  %v1303_v47 = vand.u32 2147483648, %v1276_v19  ;;  %vm1297_vm7 = vweird.f32 %v1276_v19  ;;  %v1301_v8 = vand.u32 2147483647, %v1276_v19 }
0x1079   :  { %v1304_v33 = vor.u32 1.1754944e-38, %v1303_v47  ;;  %vm1302_vm9 = vcmp.eq.f32.partialorder %v1301_v8, 8.507059e+37 }
0x107d   :  { %v1969_v41 = vpop.eup %1968 }
0x107e   :  { %v1293_v45 = vmul.f32 %v1969_v41, %v1276_v19  ;;  %vm1298_vm6 = vweird.f32 %v1969_v41 }
0x107f   :  { %vm1299_vm8 = vmor %vm1297_vm7, %vm1298_vm6 }
0x1080   :  { %v1294_v48 = vsub.f32 1.0, %v1293_v45 }
0x1082   :  { %v1295_v26 = vmul.f32 %v1969_v41, %v1294_v48 }
0x1084   :  { %v1296_v30 = vadd.f32 %v1969_v41, %v1295_v26 }
0x1086   :  { %v1300_v55 = vsel %vm1299_vm8, %v1969_v41, %v1296_v30 }
0x1087   :  { %v1305_v36 = vsel %vm1302_vm9, %v1304_v33, %v1300_v55 }
0x1088   :  { %v1318_v59 = vsub.f32 1.0, %v1305_v36  ;;  %v1324_v27 = vmul.f32 %v1305_v36, %v2576_v14 }
0x10b0   :  { %v1258_v31 = vpop.permute.xlu2 %1257 }
0x10b1   :  { %v1260_v35 = vmul.f32 %v1258_v31, %v1255_v9 }
0x10b3   :  { %v2608_v39 = vadd.f32 %v1261_v34, %v1260_v35 }
0x10b5   :  { %1328 = vrot.lane.b32.xlu1 %v2608_v39, %s2184_s17 }
0x10e6   :  { %v1321_v60 = vpop.permute.xlu0 %1320 }
0x10e7   :  { %v1323_v37 = vmul.f32 %v1321_v60, %v1318_v59 }
0x10e9   :  { %v2613_v62 = vadd.f32 %v1324_v27, %v1323_v37 }
0x10eb   :  { %1326 = vst.msk [vmem:[#allocation2 + $0x28] sm:$0xff] %vm219_vm1, %v2613_v62  ;;  %1332 = vrot.lane.b32.xlu2 %v2613_v62, %s2182_s3 }
0x1127   :  { %v1329_v63 = vpop.permute.xlu1 %1328 }
0x1145   :  { %v1333_v1 = vpop.permute.xlu2 %1332 }
0x1146   :  { %v1335_v43 = vsel %vm219_vm1, %v1329_v63, %v1333_v1 }
0x1147   :  { %v1336_v57 = vpack.c.bf16 %v1335_v43, %v1335_v43 }
0x1149   :  { %1827 = vmatmul.msk.bf16.vlgmr.msra.gmra.mxu3 %vm301_vm2, %v1336_v57  ;;  %1828 = vmatmul.msk.bf16.vlgmr.msra.gmra.mxu0 %vm301_vm2, %v1336_v57 }
0x114a   :  { %1829 = vmatmul.msk.bf16.vlgmr.msra.gmra.mxu1 %vm301_vm2, %v1336_v57 }
0x11c6   :  { %v1362_v14 = vpop.f32.mrf.mxu0 }
0x11c7   :  { %v2624_v22 = vadd.f32 %v1362_v14, %v2346_v24  ;;  %v1375_v44 = vpop.f32.mrf.mxu1 }
0x11c8   :  { %v1376_v46 = vadd.f32 %v1375_v44, %v2356_v49 }
0x11c9   :  { %1419 = vrot.lane.b32.xlu0 %v2624_v22, %s2182_s3 }
0x11ca   :  { %1463 = vrot.lane.b32.xlu2 %v1376_v46, %s2184_s17 }
0x11cc   :  { %v1349_v2 = vpop.f32.mrf.mxu3 }
0x11cd   :  { %v1350_v53 = vadd.f32 %v1349_v2, %v2271_v38 }
0x11ce   :  { %v1364_v3 = vpop.f32.mrf.mxu0 }
0x11cf   :  { %v1377_v51 = vpop.f32.mrf.mxu1  ;;  %1400 = vrot.lane.b32.xlu1 %v1350_v53, %s2183_s16  ;;  %v1379_v10 = vadd.f32 %v1350_v53, %v259_v7 }
0x11d1   :  { %v1830_v12 = vmul.f32 -1.442695, %v1379_v10 }
0x11d3   :  { %1970 = vpow2.f32 %v1830_v12 }
0x11d4   :  { %v1351_v5 = vpop.f32.mrf.mxu3 }
0x11d9   :  { %v1971_v56 = vpop.eup %1970 }
0x11da   :  { %v1383_v18 = vadd.f32 1.0, %v1971_v56 }
0x11dc   :  { %1972 = vrcp.f32 %v1383_v18  ;;  %v1395_v21 = vand.u32 2147483648, %v1383_v18  ;;  %vm1389_vm11 = vweird.f32 %v1383_v18  ;;  %v1393_v16 = vand.u32 2147483647, %v1383_v18 }
0x11de   :  { %v1396_v50 = vor.u32 1.1754944e-38, %v1395_v21  ;;  %vm1394_vm13 = vcmp.eq.f32.partialorder %v1393_v16, 8.507059e+37 }
0x11e2   :  { %v1973_v20 = vpop.eup %1972 }
0x11e3   :  { %v1385_v58 = vmul.f32 %v1973_v20, %v1383_v18  ;;  %vm1390_vm10 = vweird.f32 %v1973_v20 }
0x11e4   :  { %vm1391_vm12 = vmor %vm1389_vm11, %vm1390_vm10 }
0x11e5   :  { %v1386_v4 = vsub.f32 1.0, %v1385_v58 }
0x11e7   :  { %v1387_v6 = vmul.f32 %v1973_v20, %v1386_v4 }
0x11e9   :  { %v1388_v17 = vadd.f32 %v1973_v20, %v1387_v6 }
0x11eb   :  { %v1392_v54 = vsel %vm1391_vm12, %v1973_v20, %v1388_v17 }
0x11ec   :  { %v1397_v42 = vsel %vm1394_vm13, %v1396_v50, %v1392_v54  ;;  %v1598_v54 = vld [vmem:[#allocation2] sm:$0xff]  ;;  %v1599_v50 = vld [vmem:[#allocation2 + $0x8] sm:$0xff] }
0x11ed   :  { %v1410_v59 = vsub.f32 1.0, %v1397_v42  ;;  %v1416_v27 = vmul.f32 %v1397_v42, %v2608_v39 }
0x1224   :  { %v1464_v19 = vpop.permute.xlu2 %1463 }
0x123b   :  { %v1420_v11 = vpop.permute.xlu0 %1419 }
0x123c   :  { %v1422_v13 = vadd.f32 %v1420_v11, %v1350_v53  ;;  %v1423_v33 = vadd.f32 %v1420_v11, %v2624_v22 }
0x123e   :  { %v1831_v15 = vmul.f32 -1.442695, %v1422_v13  ;;  %v1832_v36 = vmul.f32 -1.442695, %v1423_v33 }
0x1240   :  { %1974 = vpow2.f32 %v1831_v15 }
0x1241   :  { %v1401_v23 = vpop.permute.xlu1 %1400 }
0x1242   :  { %v1403_v61 = vmul.f32 %v1401_v23, %v1397_v42  ;;  %v2660_v42 = vld [vmem:[#allocation8 + $0x31] ss:$0 sm:$0xff] }
0x1244   :  { %1405 = vrot.lane.b32.xlu0 %v1403_v61, %s2183_s16  ;;  %v1600_v61 = vld [vmem:[#allocation2 + $0x10] sm:$0xff] }
0x1246   :  { %v1975_v25 = vpop.eup %1974 }
0x1247   :  { %v1430_v28 = vadd.f32 1.0, %v1975_v25 }
0x1249   :  { %1976 = vrcp.f32 %v1430_v28  ;;  %v1443_v31 = vand.u32 2147483648, %v1430_v28  ;;  %v1441_v34 = vand.u32 2147483647, %v1430_v28  ;;  %vm1437_vm14 = vweird.f32 %v1430_v28 }
0x124b   :  { %v1444_v40 = vor.u32 1.1754944e-38, %v1443_v31  ;;  %vm1442_vm3 = vcmp.eq.f32.partialorder %v1441_v34, 8.507059e+37  ;;  %v1603_v34 = vld [vmem:[#allocation2 + $0x28] sm:$0xff] }
0x124f   :  { %v1977_v29 = vpop.eup %1976 }
0x1250   :  { %v1433_v0 = vmul.f32 %v1977_v29, %v1430_v28  ;;  %vm1438_vm0 = vweird.f32 %v1977_v29  ;;  %v1601_v28 = vld [vmem:[#allocation2 + $0x18] sm:$0xff] }
0x1251   :  { %vm1439_vm15 = vmor %vm1437_vm14, %vm1438_vm0 }
0x1252   :  { %v1434_v9 = vsub.f32 1.0, %v1433_v0 }
0x1254   :  { %v1435_v32 = vmul.f32 %v1977_v29, %v1434_v9  ;;  %v1602_v9 = vld [vmem:[#allocation2 + $0x20] sm:$0xff] }
0x1256   :  { %v1436_v35 = vadd.f32 %v1977_v29, %v1435_v32 }
0x1258   :  { %v1440_v52 = vsel %vm1439_vm15, %v1977_v29, %v1436_v35 }
0x1259   :  { %v1445_v41 = vsel %vm1442_vm3, %v1444_v40, %v1440_v52 }
0x125a   :  { %v1466_v45 = vmul.f32 %v1464_v19, %v1445_v41 }
0x125c   :  { %1468 = vrot.lane.b32.xlu1 %v1466_v45, %s2183_s16 }
0x12b6   :  { %v1406_v48 = vpop.permute.xlu0 %1405 }
0x12b7   :  { %v1408_v26 = vadd.f32 %v1406_v48, %v259_v7 }
0x12b9   :  { %1978 = vtanh.f32 %v1408_v26 }
0x12bf   :  { %v1979_v30 = vpop.eup %1978 }
0x12c0   :  { %1412 = vrot.lane.b32.xlu2 %v1979_v30, %s2184_s17 }
0x12ce   :  { %v1469_v47 = vpop.permute.xlu1 %1468 }
0x12cf   :  { %v1471_v8 = vadd.f32 %v1469_v47, %v2624_v22 }
0x12d1   :  { %1980 = vtanh.f32 %v1471_v8 }
0x12d2   :  { %1982 = vpow2.f32 %v1832_v36 }
0x12d7   :  { %v1981_v55 = vpop.eup %1980 }
0x12d8   :  { %1475 = vrot.lane.b32.xlu0 %v1981_v55, %s2184_s17  ;;  %v1983_v1 = vpop.eup %1982 }
0x12d9   :  { %v1431_v43 = vadd.f32 1.0, %v1983_v1 }
0x12db   :  { %1984 = vrcp.f32 %v1431_v43  ;;  %v1458_v22 = vand.u32 2147483648, %v1431_v43  ;;  %vm1452_vm5 = vweird.f32 %v1431_v43  ;;  %v1456_v53 = vand.u32 2147483647, %v1431_v43 }
0x12dc   :  { %1986 = vtanh.f32 %v1598_v54 }
0x12dd   :  { %v1459_v39 = vor.u32 1.1754944e-38, %v1458_v22  ;;  %vm1457_vm7 = vcmp.eq.f32.partialorder %v1456_v53, 8.507059e+37  ;;  %1988 = vtanh.f32 %v1599_v50 }
0x12de   :  { %1990 = vtanh.f32 %v1600_v61 }
0x12df   :  { %1992 = vtanh.f32 %v1601_v28 }
0x12e0   :  { %1994 = vtanh.f32 %v1602_v9 }
0x12e1   :  { %v1985_v57 = vpop.eup %1984  ;;  %1996 = vtanh.f32 %v1603_v34 }
0x12e2   :  { %v1448_v14 = vmul.f32 %v1985_v57, %v1431_v43  ;;  %vm1453_vm4 = vweird.f32 %v1985_v57  ;;  %v1987_v23 = vpop.eup %1986 }
0x12e3   :  { %vm1454_vm6 = vmor %vm1452_vm5, %vm1453_vm4  ;;  %v1989_v25 = vpop.eup %1988 }
0x12e4   :  { %v1449_v44 = vsub.f32 1.0, %v1448_v14  ;;  %v1991_v29 = vpop.eup %1990 }
0x12e5   :  { %v1616_v0 = vmul.f32 %v1991_v29, %v2660_v42  ;;  %v1993_v31 = vpop.eup %1992 }
0x12e6   :  { %v1450_v46 = vmul.f32 %v1985_v57, %v1449_v44  ;;  %v1617_v32 = vmul.f32 %v1993_v31, %v2660_v42  ;;  %v1995_v35 = vpop.eup %1994 }
0x12e7   :  { %v1618_v40 = vmul.f32 %v1995_v35, %v2660_v42  ;;  %v1997_v19 = vpop.eup %1996 }
0x12e8   :  { %v1451_v2 = vadd.f32 %v1985_v57, %v1450_v46  ;;  %v1619_v41 = vmul.f32 %v1997_v19, %v2660_v42  ;;  %v2017_v46 = vld [vmem:[#allocation8 + $0x33] ss:$0 sm:$0xff] }
0x12ea   :  { %v1455_v3 = vsel %vm1454_vm6, %v1985_v57, %v1451_v2 }
0x12eb   :  { %v1460_v51 = vsel %vm1457_vm7, %v1459_v39, %v1455_v3 }
0x12ec   :  { %v1473_v5 = vsub.f32 1.0, %v1460_v51  ;;  %v1479_v10 = vmul.f32 %v1460_v51, %v2613_v62 }
0x131a   :  { %v1413_v60 = vpop.permute.xlu2 %1412 }
0x131b   :  { %v1415_v37 = vmul.f32 %v1413_v60, %v1410_v59 }
0x131d   :  { %v1417_v63 = vadd.f32 %v1416_v27, %v1415_v37 }
0x131f   :  { %1483 = vrot.lane.b32.xlu1 %v1417_v63, %s2184_s17 }
0x134a   :  { %v1476_v7 = vpop.permute.xlu0 %1475 }
0x134b   :  { %v1478_v12 = vmul.f32 %v1476_v7, %v1473_v5 }
0x134d   :  { %v2643_v56 = vadd.f32 %v1479_v10, %v1478_v12 }
0x134f   :  { %1481 = vst.msk [vmem:[#allocation2 + $0x30] sm:$0xff] %vm219_vm1, %v2643_v56  ;;  %1487 = vrot.lane.b32.xlu2 %v2643_v56, %s2182_s3 }
0x1356   :  { %v1604_v52 = vld [vmem:[#allocation2 + $0x30] sm:$0xff] }
0x1357   :  { %1998 = vtanh.f32 %v1604_v52 }
0x135d   :  { %v1999_v45 = vpop.eup %1998 }
0x135e   :  { %v1620_v48 = vmul.f32 %v1999_v45, %v2660_v42 }
0x1391   :  { %v1484_v18 = vpop.permute.xlu1 %1483 }
0x13a9   :  { %v1488_v20 = vpop.permute.xlu2 %1487 }
0x13aa   :  { %v1490_v58 = vsel %vm219_vm1, %v1484_v18, %v1488_v20 }
0x13ab   :  { %v1491_v4 = vpack.c.bf16 %v1490_v58, %v1490_v58 }
0x13ad   :  { %1833 = vmatmul.msk.bf16.vlgmr.msrb.gmra.mxu2 %vm301_vm2, %v1491_v4  ;;  %1834 = vmatmul.msk.bf16.vlgmr.msrb.gmra.mxu3 %vm301_vm2, %v1491_v4 }
0x13ae   :  { %1835 = vmatmul.msk.bf16.vlgmr.msrb.gmra.mxu0 %vm301_vm2, %v1491_v4  ;;  %v92_v4 = vld [vmem:[#allocation8 + $0x3b] ss:$0 sm:$0xff] }
0x142b   :  { %v1530_v62 = vpop.f32.mrf.mxu0 }
0x142c   :  { %v1531_v6 = vadd.f32 %v1530_v62, %v2356_v49  ;;  %v1614_v49 = vmul.f32 %v1987_v23, %v2660_v42 }
0x142e   :  { %1579 = vrot.lane.b32.xlu1 %v1531_v6, %s2184_s17 }
0x1430   :  { %v1504_v17 = vpop.f32.mrf.mxu2  ;;  %v1517_v11 = vpop.f32.mrf.mxu3 }
0x1431   :  { %v2656_v21 = vadd.f32 %v1517_v11, %v2346_v24  ;;  %v1615_v24 = vmul.f32 %v1989_v25, %v2660_v42  ;;  %v1505_v26 = vadd.f32 %v1504_v17, %v2271_v38  ;;  %v1678_v25 = vld [vmem:[#allocation6] sm:$0xff] }
0x1433   :  { %v1532_v13 = vpop.f32.mrf.mxu0  ;;  %1535 = vrot.lane.b32.xlu0 %v2656_v21, %s2182_s3 }
0x1438   :  { %v1506_v16 = vpop.f32.mrf.mxu2  ;;  %v1519_v15 = vpop.f32.mrf.mxu3 }
0x1463   :  { %1622 = vxpose.xlu1.b32.start [1/8] (short) (narrow) %v1614_v49, 32 }
0x146b   :  { %1623 = vxpose.xlu1.b32.cont [2/8] (short) (narrow) %v1615_v24, 32  ;;  %v1679_v24 = vld [vmem:[#allocation6 + $0x8] sm:$0xff] }
0x1473   :  { %1624 = vxpose.xlu1.b32.cont [3/8] (short) (narrow) %v1616_v0, 32 }
0x147b   :  { %1625 = vxpose.xlu1.b32.cont [4/8] (short) (narrow) %v1617_v32, 32 }
0x1483   :  { %1626 = vxpose.xlu1.b32.cont [5/8] (short) (narrow) %v1618_v40, 32 }
0x148b   :  { %1627 = vxpose.xlu1.b32.cont [6/8] (short) (narrow) %v1619_v41, 32 }
0x1493   :  { %1628 = vxpose.xlu1.b32.cont [7/8] (short) (narrow) %v1620_v48, 32 }
0x14a0   :  { %v1580_v38 = vpop.permute.xlu1 %1579 }
0x14a5   :  { %v1536_v30 = vpop.permute.xlu0 %1535 }
0x14a6   :  { %v1538_v47 = vadd.f32 %v1536_v30, %v1505_v26  ;;  %v1539_v3 = vadd.f32 %v1536_v30, %v2656_v21 }
0x14a8   :  { %v1836_v8 = vmul.f32 -1.442695, %v1538_v47  ;;  %v1837_v39 = vmul.f32 -1.442695, %v1539_v3 }
0x14aa   :  { %2000 = vpow2.f32 %v1836_v8 }
0x14b0   :  { %v2001_v55 = vpop.eup %2000 }
0x14b1   :  { %v1546_v33 = vadd.f32 1.0, %v2001_v55 }
0x14b3   :  { %2002 = vrcp.f32 %v1546_v33  ;;  %v1559_v27 = vand.u32 2147483648, %v1546_v33  ;;  %v1557_v63 = vand.u32 2147483647, %v1546_v33  ;;  %vm1553_vm9 = vweird.f32 %v1546_v33 }
0x14b5   :  { %v1560_v43 = vor.u32 1.1754944e-38, %v1559_v27  ;;  %vm1558_vm11 = vcmp.eq.f32.partialorder %v1557_v63, 8.507059e+37 }
0x14b9   :  { %v2003_v36 = vpop.eup %2002 }
0x14ba   :  { %v1549_v59 = vmul.f32 %v2003_v36, %v1546_v33  ;;  %vm1554_vm8 = vweird.f32 %v2003_v36 }
0x14bb   :  { %vm1555_vm10 = vmor %vm1553_vm9, %vm1554_vm8 }
0x14bc   :  { %v1550_v60 = vsub.f32 1.0, %v1549_v59 }
0x14be   :  { %v1551_v37 = vmul.f32 %v2003_v36, %v1550_v60 }
0x14c0   :  { %v1552_v1 = vadd.f32 %v2003_v36, %v1551_v37 }
0x14c2   :  { %v1556_v57 = vsel %vm1555_vm10, %v2003_v36, %v1552_v1 }
0x14c3   :  { %v1561_v14 = vsel %vm1558_vm11, %v1560_v43, %v1556_v57 }
0x14c4   :  { %v1582_v44 = vmul.f32 %v1580_v38, %v1561_v14 }
0x14c6   :  { %1584 = vrot.lane.b32.xlu2 %v1582_v44, %s2183_s16 }
0x14ce   :  { %1669 = vrot.lane.b32.xlu2 %v2017_v46, %s2182_s3 }
0x1520   :  { %v1585_v2 = vpop.permute.xlu2 %1584 }
0x1521   :  { %v1587_v22 = vadd.f32 %v1585_v2, %v2656_v21 }
0x1523   :  { %2004 = vtanh.f32 %v1587_v22 }
0x1524   :  { %2006 = vpow2.f32 %v1837_v39 }
0x1528   :  { %v1670_v30 = vpop.permute.xlu2 %1669 }
0x1529   :  { %v2005_v53 = vpop.eup %2004 }
0x152a   :  { %1591 = vrot.lane.b32.xlu0 %v2005_v53, %s2184_s17  ;;  %v2007_v51 = vpop.eup %2006 }
0x152b   :  { %v1547_v5 = vadd.f32 1.0, %v2007_v51 }
0x152d   :  { %2008 = vrcp.f32 %v1547_v5  ;;  %v1574_v58 = vand.u32 2147483648, %v1547_v5  ;;  %vm1568_vm13 = vweird.f32 %v1547_v5  ;;  %v1572_v62 = vand.u32 2147483647, %v1547_v5 }
0x152f   :  { %v1575_v17 = vor.u32 1.1754944e-38, %v1574_v58  ;;  %vm1573_vm14 = vcmp.eq.f32.partialorder %v1572_v62, 8.507059e+37 }
0x1532   :  { %1671 = vrot.lane.b32.xlu0 %v92_v4, %s2182_s3 }
0x1533   :  { %v2009_v7 = vpop.eup %2008 }
0x1534   :  { %v1564_v10 = vmul.f32 %v2009_v7, %v1547_v5  ;;  %vm1569_vm12 = vweird.f32 %v2009_v7 }
0x1535   :  { %vm1570_vm0 = vmor %vm1568_vm13, %vm1569_vm12 }
0x1536   :  { %v1565_v12 = vsub.f32 1.0, %v1564_v10 }
0x1538   :  { %v1566_v18 = vmul.f32 %v2009_v7, %v1565_v12 }
0x153a   :  { %v1567_v20 = vadd.f32 %v2009_v7, %v1566_v18 }
0x153c   :  { %v1571_v6 = vsel %vm1570_vm0, %v2009_v7, %v1567_v20 }
0x153d   :  { %v1576_v11 = vsel %vm1573_vm14, %v1575_v17, %v1571_v6 }
0x153e   :  { %v1589_v21 = vsub.f32 1.0, %v1576_v11  ;;  %v1595_v16 = vmul.f32 %v1576_v11, %v2643_v56 }
0x159c   :  { %v1592_v13 = vpop.permute.xlu0 %1591 }
0x159d   :  { %v1594_v15 = vmul.f32 %v1592_v13, %v1589_v21 }
0x159f   :  { %v1596_v54 = vadd.f32 %v1595_v16, %v1594_v15 }
0x15a1   :  { %1597 = vst.msk [vmem:[#allocation2 + $0x38] sm:$0xff] %vm219_vm1, %v1596_v54 }
0x15a4   :  { %v1672_v26 = vpop.permute.xlu0 %1671 }
0x15a5   :  { %v1673_v8 = vsel %vm219_vm1, %v1670_v30, %v1672_v26 }
0x15a8   :  { %v1605_v50 = vld [vmem:[#allocation2 + $0x38] sm:$0xff] }
0x15a9   :  { %2010 = vtanh.f32 %v1605_v50 }
0x15aa   :  { %2012 = vtanh.f32 %v1678_v25 }
0x15ab   :  { %2014 = vtanh.f32 %v1679_v24 }
0x15af   :  { %v2011_v23 = vpop.eup %2010 }
0x15b0   :  { %v1621_v49 = vmul.f32 %v2011_v23, %v2660_v42  ;;  %v2013_v56 = vpop.eup %2012 }
0x15b1   :  { %v2015_v29 = vpop.eup %2014  ;;  %1682 = vst.msk [vmem:[#allocation12] sm:$0xff] %vm219_vm1, %v2013_v56 }
0x15b2   :  { %1629 = vxpose.xlu1.b32.end [8/8] (short) (narrow) %v1621_v49, 32  ;;  %1683 = vst.msk [vmem:[#allocation12 + $0x8] sm:$0xff] %vm219_vm1, %v2015_v29 }
0x15b3   :  { %1707 = dma.vmem_to_hbm [thread:$0]  %s1700_s19, 256, %s1702_s22, [#allocation13], %s2173_s26, %s2173_s26, %s2174_s27  }
0x15b4   :  { %s1691_s26 = sshll.u32 %s2700_s4, 4  ;;  %s1692_s26 = int_to_ptr.hbm [resolvable:$true] %s1691_s26 }
0x161e   :  { %v1638_v61 = vpop.trf.xlu1 }
0x161f   :  { %v1654_v9 = vsel %vm301_vm2, %v1638_v61, 0.0 }
0x1626   :  { %v1639_v28 = vpop.trf.xlu1 }
0x1627   :  { %v1655_v0 = vsel %vm301_vm2, %v1639_v28, 0.0 }
0x1628   :  { %v1656_v32 = vadd.f32 %v1655_v0, %v1654_v9 }
0x162e   :  { %v1640_v42 = vpop.trf.xlu1 }
0x162f   :  { %v1657_v31 = vsel %vm301_vm2, %v1640_v42, 0.0 }
0x1630   :  { %v1658_v34 = vadd.f32 %v1657_v31, %v1656_v32 }
0x1636   :  { %v1641_v35 = vpop.trf.xlu1 }
0x1637   :  { %v1659_v40 = vsel %vm301_vm2, %v1641_v35, 0.0 }
0x1638   :  { %v1660_v52 = vadd.f32 %v1659_v40, %v1658_v34 }
0x163a   :  { %v1661_v19 = vrot.slane %v1660_v52, 4 }
0x163c   :  { %v1662_v41 = vadd.f32 %v1661_v19, %v1660_v52 }
0x163e   :  { %v1663_v45 = vrot.slane %v1662_v41, 2 }
0x1640   :  { %v1664_v48 = vadd.f32 %v1663_v45, %v1662_v41 }
0x1642   :  { %v1665_v47 = vrot.slane %v1664_v48, 1 }
0x1644   :  { %v1666_v55 = vadd.f32 %v1665_v47, %v1664_v48 }
0x1646   :  { %v1675_v33 = vadd.f32 %v1673_v8, %v1666_v55 }
0x1648   :  { %v1676_v36 = vsel %vm301_vm2, %v1675_v33, 0.0 }
0x1649   :  { %1677 = vst [vmem:[#allocation11] sm:$0x1] %v1676_v36 }
0x164a   :  { %1694 = dma.vmem_to_hbm [thread:$0]  %s1690_s23, 16, %s1692_s26, [#allocation5]  }
0x164b   :  { %2168 = dma.done.wait [#allocation5], 16  }
0x164c   :  { %2169 = vsyncadd [#allocation5], 4294967280 }
0x164d   :  { %2170 = dma.done.wait [#allocation13], 256  }
0x164e   :  { %2171 = vsyncadd [#allocation13], 4294967040 }
0x164f   :  { %1716 = vsyncpa [#allocation4], 1 }
0x1650   :  { %1717 = vsyncpa [#allocation7], 1 }
0x1651   :  { %1718 = vsyncpa [#allocation10], 1 }
0x1652   :  { %1719 = vsyncpa [#allocation5], 1 }
0x1653   :  { %1720 = vsyncpa [#allocation13], 1 }

</bundles_post_ra>
